<compile_context>
chip_gen: v5e
topology: v5e:2x2
jax: 0.10.0
libtpu: 0.0.40
codegen_flags: <defaults>
</compile_context>

<pallas_src>
import jax
import jax.numpy as jnp
from jax.experimental import pallas as pl
from jax.experimental.pallas import tpu as pltpu

BN_EPS = 1e-5


# ---------------------------------------------------------------------------
# Fused kernel: gin1 + bn1 + gin2 + bn2 + global_add_pool + lin1(+bn3) +
#               leaky_relu + lin2 + sigmoid
# ---------------------------------------------------------------------------
def fused_gin_kernel(
    scalars_ref,                                   # SMEM [3]: eps1, eps2, lin2 bias
    x_ref,                                         # [N, Cin]
    src_oh_ref,                                    # [E, N]  one-hot of edge source
    tgt_ohT_ref,                                   # [N, E]  one-hot^T of edge target
    ea_ref,                                        # [E, De]
    pool_ref,                                      # [B, N]  graph-membership one-hot
    # GIN layer 1 (BN-folded)
    l1_lw_ref, l1_lb_ref, l1_w1_ref, l1_b1_ref,
    l1_w2_ref, l1_b2_ref, l1_s_ref, l1_t_ref,
    # GIN layer 2 (BN-folded)
    l2_lw_ref, l2_lb_ref, l2_w1_ref, l2_b1_ref,
    l2_w2_ref, l2_b2_ref, l2_s_ref, l2_t_ref,
    # head (bn3 folded into lin1; lin2 weight as a row vector)
    h_w1a_ref, h_w1b_ref, h_b1_ref, h_w2r_ref,
    out_ref,                                       # [B, 1]
):
    hi = jax.lax.Precision.HIGHEST
    dot = lambda a, b: jnp.dot(a, b, preferred_element_type=jnp.float32,
                               precision=hi)

    src_oh = src_oh_ref[...]
    tgt_ohT = tgt_ohT_ref[...]
    ea = ea_ref[...]

    def gin_layer(x, lw, lb, eps, w1, b1, w2, b2, s, t):
        # message: relu(x_j + Linear(edge_attr)); aggregate = scatter-add
        e = dot(ea, lw) + lb                       # [E, C]
        x_j = dot(src_oh, x)                       # gather x[src]       [E, C]
        msg = jnp.maximum(x_j + e, 0.0)
        agg = dot(tgt_ohT, msg)                    # scatter-add to tgt  [N, C]
        out = agg + (1.0 + eps) * x
        # mlp: Linear(+folded BN) -> ReLU -> Linear -> ReLU
        h = jnp.maximum(dot(out, w1) + b1, 0.0)
        h = jnp.maximum(dot(h, w2) + b2, 0.0)
        # outer BatchNorm (bn1 / bn2), folded to scale/shift
        return h * s + t

    x1 = gin_layer(x_ref[...], l1_lw_ref[...], l1_lb_ref[...], scalars_ref[0],
                   l1_w1_ref[...], l1_b1_ref[...], l1_w2_ref[...], l1_b2_ref[...],
                   l1_s_ref[...], l1_t_ref[...])
    x2 = gin_layer(x1, l2_lw_ref[...], l2_lb_ref[...], scalars_ref[1],
                   l2_w1_ref[...], l2_b1_ref[...], l2_w2_ref[...], l2_b2_ref[...],
                   l2_s_ref[...], l2_t_ref[...])

    # head:  lin1(cat(pool(x1), pool(x2))) == pool @ (x1 @ W1_top + x2 @ W1_bot)
    # (pool and lin1 are both linear; dropout is identity in eval mode)
    y = dot(x1, h_w1a_ref[...]) + dot(x2, h_w1b_ref[...])   # [N, 2H]
    h = dot(pool_ref[...], y) + h_b1_ref[...]               # [B, 2H]
    h = jnp.where(h > 0.0, h, 0.01 * h)                     # leaky_relu
    # lin2 ([2H] -> 1) as a lane reduction instead of a 1-column MXU matmul
    o = jnp.sum(h * h_w2r_ref[...], axis=-1, keepdims=True) + scalars_ref[2]
    out_ref[...] = jax.nn.sigmoid(o)


# ---------------------------------------------------------------------------
# Parameter construction (raw, module-faithful) + eval-mode BN folding
# ---------------------------------------------------------------------------
def init_gin_params(key, in_c, hidden, edge_dim):
    ks = jax.random.split(key, 8)
    u = lambda k, s: jax.random.uniform(k, s, jnp.float32, -0.3, 0.3)
    return {
        "lin_w": u(ks[0], (edge_dim, in_c)),
        "lin_b": u(ks[1], (1, in_c)),
        "eps": jnp.zeros((), jnp.float32),               # Parameter([0])
        "w1": u(ks[2], (in_c, hidden)),
        "b1": u(ks[3], (1, hidden)),
        "bn1_g": jnp.ones((1, hidden), jnp.float32),     # mlp-internal BN
        "bn1_b": jnp.zeros((1, hidden), jnp.float32),
        "bn1_m": jnp.zeros((1, hidden), jnp.float32),
        "bn1_v": jnp.ones((1, hidden), jnp.float32),
        "w2": u(ks[4], (hidden, hidden)),
        "b2": u(ks[5], (1, hidden)),
        "obn_g": 1.0 + u(ks[6], (1, hidden)),            # outer bn1 / bn2
        "obn_b": u(ks[7], (1, hidden)),
        "obn_m": jnp.zeros((1, hidden), jnp.float32),
        "obn_v": jnp.ones((1, hidden), jnp.float32),
    }


def init_head_params(key, hidden):
    ks = jax.random.split(key, 5)
    u = lambda k, s: jax.random.uniform(k, s, jnp.float32, -0.3, 0.3)
    return {
        "w1": u(ks[0], (2 * hidden, 2 * hidden)),
        "b1": u(ks[1], (1, 2 * hidden)),
        "bn3_g": 1.0 + u(ks[2], (1, 2 * hidden)),
        "bn3_b": u(ks[3], (1, 2 * hidden)),
        "bn3_m": jnp.zeros((1, 2 * hidden), jnp.float32),
        "bn3_v": jnp.ones((1, 2 * hidden), jnp.float32),
        "w2": u(ks[4], (2 * hidden, 1)),
        "b2": jnp.full((), 0.05, jnp.float32),
    }


def _bn_fold(g, b, m, v):
    scale = g * jax.lax.rsqrt(v + BN_EPS)
    return scale, b - m * scale


def fold_gin_params(p):
    s1, t1 = _bn_fold(p["bn1_g"], p["bn1_b"], p["bn1_m"], p["bn1_v"])
    so, to = _bn_fold(p["obn_g"], p["obn_b"], p["obn_m"], p["obn_v"])
    return {
        "lin_w": p["lin_w"], "lin_b": p["lin_b"], "eps": p["eps"],
        "w1": p["w1"] * s1, "b1": p["b1"] * s1 + t1,     # bn1 folded into lin1
        "w2": p["w2"], "b2": p["b2"],
        "obn_s": so, "obn_t": to,                         # outer BN as FMA
    }


def fold_head_params(p, hidden):
    s3, t3 = _bn_fold(p["bn3_g"], p["bn3_b"], p["bn3_m"], p["bn3_v"])
    w1f = p["w1"] * s3                                    # bn3 folded into lin1
    return {
        "w1a": w1f[:hidden, :], "w1b": w1f[hidden:, :],
        "b1": p["b1"] * s3 + t3,
        "w2row": p["w2"].T,                               # [1, 2H]
        "b2": p["b2"],
    }


# ---------------------------------------------------------------------------
# Forward
# ---------------------------------------------------------------------------
def gin_molhiv_forward(x, edge_index, edge_attr, batch, p_gin1, p_gin2, p_head,
                       hidden, num_graphs):
    N, Cin = x.shape
    E, De = edge_attr.shape
    B, H = num_graphs, hidden

    # TODO(synk): for realistic ogbg-molhiv batch sizes (N ~ 1e4+, E ~ 2N) the
    # dense O(N*E) one-hots blow VMEM (hitting v7x's 64 MiB first); replace
    # with a scalar-prefetched index gather + segment-sum and a node-tile grid
    # marked "parallel" (v7x 2-TC sharding). Kept here only because N*E is toy.
    src_oh = jax.nn.one_hot(edge_index[0], N, dtype=jnp.float32)       # [E, N]
    tgt_ohT = jax.nn.one_hot(edge_index[1], N, dtype=jnp.float32).T    # [N, E]
    pool = jax.nn.one_hot(batch, num_graphs, dtype=jnp.float32).T      # [B, N]

    f1 = fold_gin_params(p_gin1)
    f2 = fold_gin_params(p_gin2)
    fh = fold_head_params(p_head, H)
    scalars = jnp.stack([f1["eps"], f2["eps"], fh["b2"]])              # SMEM [3]

    args = (scalars, x, src_oh, tgt_ohT, edge_attr, pool,
            f1["lin_w"], f1["lin_b"], f1["w1"], f1["b1"], f1["w2"], f1["b2"],
            f1["obn_s"], f1["obn_t"],
            f2["lin_w"], f2["lin_b"], f2["w1"], f2["b1"], f2["w2"], f2["b2"],
            f2["obn_s"], f2["obn_t"],
            fh["w1a"], fh["w1b"], fh["b1"], fh["w2row"])

    vmem = pl.BlockSpec(memory_space=pltpu.MemorySpace.VMEM)
    smem = pl.BlockSpec(memory_space=pltpu.MemorySpace.SMEM)
    in_specs = [smem] + [vmem] * (len(args) - 1)

    flops = (
        # layer 1
        2 * E * De * Cin + 2 * E * N * Cin + 2 * N * E * Cin
        + 2 * N * Cin * H + 2 * N * H * H
        # layer 2
        + 2 * E * De * H + 2 * E * N * H + 2 * N * E * H
        + 2 * N * H * H + 2 * N * H * H
        # head
        + 2 * 2 * N * H * (2 * H) + 2 * B * N * (2 * H) + 2 * B * (2 * H))
    bytes_accessed = 4 * (sum(int(a.size) for a in args) + B * 1)

    return pl.pallas_call(
        fused_gin_kernel,
        out_shape=jax.ShapeDtypeStruct((B, 1), jnp.float32),
        in_specs=in_specs,
        out_specs=vmem,
        cost_estimate=pl.CostEstimate(flops=flops, transcendentals=B,
                                      bytes_accessed=bytes_accessed),
    )(*args)


if __name__ == "__main__":
    in_channels, hidden_channels, edge_dim = 8, 32, 4
    N, E, num_graphs = 16, 32, 2

    key = jax.random.PRNGKey(0)
    k_x, k_ei, k_ea, k_p1, k_p2, k_ph = jax.random.split(key, 6)

    x = jax.random.normal(k_x, (N, in_channels), jnp.float32)
    edge_index = jax.random.randint(k_ei, (2, E), 0, N, jnp.int32)
    edge_attr = jax.random.normal(k_ea, (E, edge_dim), jnp.float32)
    batch = jnp.concatenate(
        [jnp.zeros((N // 2,), jnp.int32), jnp.ones((N - N // 2,), jnp.int32)])

    p_gin1 = init_gin_params(k_p1, in_channels, hidden_channels, edge_dim)
    p_gin2 = init_gin_params(k_p2, hidden_channels, hidden_channels, edge_dim)
    p_head = init_head_params(k_ph, hidden_channels)

    fwd = jax.jit(gin_molhiv_forward, static_argnames=("hidden", "num_graphs"))
    out = fwd(x, edge_index, edge_attr, batch, p_gin1, p_gin2, p_head,
              hidden=hidden_channels, num_graphs=num_graphs)
    out = jax.block_until_ready(out)
    assert out.shape == (num_graphs, 1)
    assert bool(jnp.all(jnp.isfinite(out)))
    print("KERNEL_OK")
</pallas_src>

<mosaic_0001>
module attributes {stable_mosaic.version = 11 : i64} {
  func.func @fused_gin_kernel(%arg0: memref<3xf32, #tpu.memory_space<smem>>, %arg1: memref<16x8xf32, #tpu.memory_space<vmem>>, %arg2: memref<32x16xf32, #tpu.memory_space<vmem>>, %arg3: memref<16x32xf32, #tpu.memory_space<vmem>>, %arg4: memref<32x4xf32, #tpu.memory_space<vmem>>, %arg5: memref<2x16xf32, #tpu.memory_space<vmem>>, %arg6: memref<4x8xf32, #tpu.memory_space<vmem>>, %arg7: memref<1x8xf32, #tpu.memory_space<vmem>>, %arg8: memref<8x32xf32, #tpu.memory_space<vmem>>, %arg9: memref<1x32xf32, #tpu.memory_space<vmem>>, %arg10: memref<32x32xf32, #tpu.memory_space<vmem>>, %arg11: memref<1x32xf32, #tpu.memory_space<vmem>>, %arg12: memref<1x32xf32, #tpu.memory_space<vmem>>, %arg13: memref<1x32xf32, #tpu.memory_space<vmem>>, %arg14: memref<4x32xf32, #tpu.memory_space<vmem>>, %arg15: memref<1x32xf32, #tpu.memory_space<vmem>>, %arg16: memref<32x32xf32, #tpu.memory_space<vmem>>, %arg17: memref<1x32xf32, #tpu.memory_space<vmem>>, %arg18: memref<32x32xf32, #tpu.memory_space<vmem>>, %arg19: memref<1x32xf32, #tpu.memory_space<vmem>>, %arg20: memref<1x32xf32, #tpu.memory_space<vmem>>, %arg21: memref<1x32xf32, #tpu.memory_space<vmem>>, %arg22: memref<32x64xf32, #tpu.memory_space<vmem>>, %arg23: memref<32x64xf32, #tpu.memory_space<vmem>>, %arg24: memref<1x64xf32, #tpu.memory_space<vmem>>, %arg25: memref<1x64xf32, #tpu.memory_space<vmem>>, %arg26: memref<2x1xf32, #tpu.memory_space<vmem>>) attributes {dimension_semantics = [], scalar_prefetch = 0 : i64, scratch_operands = 0 : i64, tpu.core_type = #tpu.core_type<tc>} {
    %c0 = arith.constant 0 : index
    %c0_0 = arith.constant 0 : index
    %0 = vector.load %arg2[%c0, %c0_0] : memref<32x16xf32, #tpu.memory_space<vmem>>, vector<32x16xf32>
    %c0_1 = arith.constant 0 : index
    %c0_2 = arith.constant 0 : index
    %1 = vector.load %arg3[%c0_1, %c0_2] : memref<16x32xf32, #tpu.memory_space<vmem>>, vector<16x32xf32>
    %c0_3 = arith.constant 0 : index
    %c0_4 = arith.constant 0 : index
    %2 = vector.load %arg4[%c0_3, %c0_4] : memref<32x4xf32, #tpu.memory_space<vmem>>, vector<32x4xf32>
    %c0_5 = arith.constant 0 : index
    %c0_6 = arith.constant 0 : index
    %3 = vector.load %arg1[%c0_5, %c0_6] : memref<16x8xf32, #tpu.memory_space<vmem>>, vector<16x8xf32>
    %c0_7 = arith.constant 0 : index
    %c0_8 = arith.constant 0 : index
    %4 = vector.load %arg6[%c0_7, %c0_8] : memref<4x8xf32, #tpu.memory_space<vmem>>, vector<4x8xf32>
    %c0_9 = arith.constant 0 : index
    %c0_10 = arith.constant 0 : index
    %5 = vector.load %arg7[%c0_9, %c0_10] : memref<1x8xf32, #tpu.memory_space<vmem>>, vector<1x8xf32>
    %c0_11 = arith.constant 0 : index
    %6 = memref.load %arg0[%c0_11] : memref<3xf32, #tpu.memory_space<smem>>
    %c0_12 = arith.constant 0 : index
    %c0_13 = arith.constant 0 : index
    %7 = vector.load %arg8[%c0_12, %c0_13] : memref<8x32xf32, #tpu.memory_space<vmem>>, vector<8x32xf32>
    %c0_14 = arith.constant 0 : index
    %c0_15 = arith.constant 0 : index
    %8 = vector.load %arg9[%c0_14, %c0_15] : memref<1x32xf32, #tpu.memory_space<vmem>>, vector<1x32xf32>
    %c0_16 = arith.constant 0 : index
    %c0_17 = arith.constant 0 : index
    %9 = vector.load %arg10[%c0_16, %c0_17] : memref<32x32xf32, #tpu.memory_space<vmem>>, vector<32x32xf32>
    %c0_18 = arith.constant 0 : index
    %c0_19 = arith.constant 0 : index
    %10 = vector.load %arg11[%c0_18, %c0_19] : memref<1x32xf32, #tpu.memory_space<vmem>>, vector<1x32xf32>
    %c0_20 = arith.constant 0 : index
    %c0_21 = arith.constant 0 : index
    %11 = vector.load %arg12[%c0_20, %c0_21] : memref<1x32xf32, #tpu.memory_space<vmem>>, vector<1x32xf32>
    %c0_22 = arith.constant 0 : index
    %c0_23 = arith.constant 0 : index
    %12 = vector.load %arg13[%c0_22, %c0_23] : memref<1x32xf32, #tpu.memory_space<vmem>>, vector<1x32xf32>
    %cst = arith.constant dense<0.000000e+00> : vector<32x8xf32>
    %13 = tpu.matmul %2, %4, %cst {dimension_numbers = #tpu.dot_dimension_numbers<[1], [0], [0], [1], [0, 0, 1, 1], [], []>, precision = #tpu.contract_precision<fp32>} : vector<32x4xf32>, vector<4x8xf32>, vector<32x8xf32> -> vector<32x8xf32>
    %14 = vector.broadcast %5 : vector<1x8xf32> to vector<32x8xf32>
    %15 = arith.addf %13, %14 : vector<32x8xf32>
    %cst_24 = arith.constant dense<0.000000e+00> : vector<32x8xf32>
    %16 = tpu.matmul %0, %3, %cst_24 {dimension_numbers = #tpu.dot_dimension_numbers<[1], [0], [0], [1], [0, 0, 1, 1], [], []>, precision = #tpu.contract_precision<fp32>} : vector<32x16xf32>, vector<16x8xf32>, vector<32x8xf32> -> vector<32x8xf32>
    %17 = arith.addf %16, %15 : vector<32x8xf32>
    %cst_25 = arith.constant 0.000000e+00 : f32
    %18 = vector.broadcast %cst_25 : f32 to vector<32x8xf32>
    %19 = arith.maximumf %17, %18 : vector<32x8xf32>
    %cst_26 = arith.constant dense<0.000000e+00> : vector<16x8xf32>
    %20 = tpu.matmul %1, %19, %cst_26 {dimension_numbers = #tpu.dot_dimension_numbers<[1], [0], [0], [1], [0, 0, 1, 1], [], []>, precision = #tpu.contract_precision<fp32>} : vector<16x32xf32>, vector<32x8xf32>, vector<16x8xf32> -> vector<16x8xf32>
    %cst_27 = arith.constant 1.000000e+00 : f32
    %21 = arith.addf %cst_27, %6 : f32
    %22 = vector.broadcast %21 : f32 to vector<16x8xf32>
    %23 = arith.mulf %22, %3 : vector<16x8xf32>
    %24 = arith.addf %20, %23 : vector<16x8xf32>
    %cst_28 = arith.constant dense<0.000000e+00> : vector<16x32xf32>
    %25 = tpu.matmul %24, %7, %cst_28 {dimension_numbers = #tpu.dot_dimension_numbers<[1], [0], [0], [1], [0, 0, 1, 1], [], []>, precision = #tpu.contract_precision<fp32>} : vector<16x8xf32>, vector<8x32xf32>, vector<16x32xf32> -> vector<16x32xf32>
    %26 = vector.broadcast %8 : vector<1x32xf32> to vector<16x32xf32>
    %27 = arith.addf %25, %26 : vector<16x32xf32>
    %cst_29 = arith.constant 0.000000e+00 : f32
    %28 = vector.broadcast %cst_29 : f32 to vector<16x32xf32>
    %29 = arith.maximumf %27, %28 : vector<16x32xf32>
    %cst_30 = arith.constant dense<0.000000e+00> : vector<16x32xf32>
    %30 = tpu.matmul %29, %9, %cst_30 {dimension_numbers = #tpu.dot_dimension_numbers<[1], [0], [0], [1], [0, 0, 1, 1], [], []>, precision = #tpu.contract_precision<fp32>} : vector<16x32xf32>, vector<32x32xf32>, vector<16x32xf32> -> vector<16x32xf32>
    %31 = vector.broadcast %10 : vector<1x32xf32> to vector<16x32xf32>
    %32 = arith.addf %30, %31 : vector<16x32xf32>
    %cst_31 = arith.constant 0.000000e+00 : f32
    %33 = vector.broadcast %cst_31 : f32 to vector<16x32xf32>
    %34 = arith.maximumf %32, %33 : vector<16x32xf32>
    %35 = vector.broadcast %11 : vector<1x32xf32> to vector<16x32xf32>
    %36 = arith.mulf %34, %35 : vector<16x32xf32>
    %37 = vector.broadcast %12 : vector<1x32xf32> to vector<16x32xf32>
    %38 = arith.addf %36, %37 : vector<16x32xf32>
    %c0_32 = arith.constant 0 : index
    %c0_33 = arith.constant 0 : index
    %39 = vector.load %arg14[%c0_32, %c0_33] : memref<4x32xf32, #tpu.memory_space<vmem>>, vector<4x32xf32>
    %c0_34 = arith.constant 0 : index
    %c0_35 = arith.constant 0 : index
    %40 = vector.load %arg15[%c0_34, %c0_35] : memref<1x32xf32, #tpu.memory_space<vmem>>, vector<1x32xf32>
    %c1 = arith.constant 1 : index
    %41 = memref.load %arg0[%c1] : memref<3xf32, #tpu.memory_space<smem>>
    %c0_36 = arith.constant 0 : index
    %c0_37 = arith.constant 0 : index
    %42 = vector.load %arg16[%c0_36, %c0_37] : memref<32x32xf32, #tpu.memory_space<vmem>>, vector<32x32xf32>
    %c0_38 = arith.constant 0 : index
    %c0_39 = arith.constant 0 : index
    %43 = vector.load %arg17[%c0_38, %c0_39] : memref<1x32xf32, #tpu.memory_space<vmem>>, vector<1x32xf32>
    %c0_40 = arith.constant 0 : index
    %c0_41 = arith.constant 0 : index
    %44 = vector.load %arg18[%c0_40, %c0_41] : memref<32x32xf32, #tpu.memory_space<vmem>>, vector<32x32xf32>
    %c0_42 = arith.constant 0 : index
    %c0_43 = arith.constant 0 : index
    %45 = vector.load %arg19[%c0_42, %c0_43] : memref<1x32xf32, #tpu.memory_space<vmem>>, vector<1x32xf32>
    %c0_44 = arith.constant 0 : index
    %c0_45 = arith.constant 0 : index
    %46 = vector.load %arg20[%c0_44, %c0_45] : memref<1x32xf32, #tpu.memory_space<vmem>>, vector<1x32xf32>
    %c0_46 = arith.constant 0 : index
    %c0_47 = arith.constant 0 : index
    %47 = vector.load %arg21[%c0_46, %c0_47] : memref<1x32xf32, #tpu.memory_space<vmem>>, vector<1x32xf32>
    %cst_48 = arith.constant dense<0.000000e+00> : vector<32x32xf32>
    %48 = tpu.matmul %2, %39, %cst_48 {dimension_numbers = #tpu.dot_dimension_numbers<[1], [0], [0], [1], [0, 0, 1, 1], [], []>, precision = #tpu.contract_precision<fp32>} : vector<32x4xf32>, vector<4x32xf32>, vector<32x32xf32> -> vector<32x32xf32>
    %49 = vector.broadcast %40 : vector<1x32xf32> to vector<32x32xf32>
    %50 = arith.addf %48, %49 : vector<32x32xf32>
    %cst_49 = arith.constant dense<0.000000e+00> : vector<32x32xf32>
    %51 = tpu.matmul %0, %38, %cst_49 {dimension_numbers = #tpu.dot_dimension_numbers<[1], [0], [0], [1], [0, 0, 1, 1], [], []>, precision = #tpu.contract_precision<fp32>} : vector<32x16xf32>, vector<16x32xf32>, vector<32x32xf32> -> vector<32x32xf32>
    %52 = arith.addf %51, %50 : vector<32x32xf32>
    %cst_50 = arith.constant 0.000000e+00 : f32
    %53 = vector.broadcast %cst_50 : f32 to vector<32x32xf32>
    %54 = arith.maximumf %52, %53 : vector<32x32xf32>
    %cst_51 = arith.constant dense<0.000000e+00> : vector<16x32xf32>
    %55 = tpu.matmul %1, %54, %cst_51 {dimension_numbers = #tpu.dot_dimension_numbers<[1], [0], [0], [1], [0, 0, 1, 1], [], []>, precision = #tpu.contract_precision<fp32>} : vector<16x32xf32>, vector<32x32xf32>, vector<16x32xf32> -> vector<16x32xf32>
    %cst_52 = arith.constant 1.000000e+00 : f32
    %56 = arith.addf %cst_52, %41 : f32
    %57 = vector.broadcast %56 : f32 to vector<16x32xf32>
    %58 = arith.mulf %57, %38 : vector<16x32xf32>
    %59 = arith.addf %55, %58 : vector<16x32xf32>
    %cst_53 = arith.constant dense<0.000000e+00> : vector<16x32xf32>
    %60 = tpu.matmul %59, %42, %cst_53 {dimension_numbers = #tpu.dot_dimension_numbers<[1], [0], [0], [1], [0, 0, 1, 1], [], []>, precision = #tpu.contract_precision<fp32>} : vector<16x32xf32>, vector<32x32xf32>, vector<16x32xf32> -> vector<16x32xf32>
    %61 = vector.broadcast %43 : vector<1x32xf32> to vector<16x32xf32>
    %62 = arith.addf %60, %61 : vector<16x32xf32>
    %cst_54 = arith.constant 0.000000e+00 : f32
    %63 = vector.broadcast %cst_54 : f32 to vector<16x32xf32>
    %64 = arith.maximumf %62, %63 : vector<16x32xf32>
    %cst_55 = arith.constant dense<0.000000e+00> : vector<16x32xf32>
    %65 = tpu.matmul %64, %44, %cst_55 {dimension_numbers = #tpu.dot_dimension_numbers<[1], [0], [0], [1], [0, 0, 1, 1], [], []>, precision = #tpu.contract_precision<fp32>} : vector<16x32xf32>, vector<32x32xf32>, vector<16x32xf32> -> vector<16x32xf32>
    %66 = vector.broadcast %45 : vector<1x32xf32> to vector<16x32xf32>
    %67 = arith.addf %65, %66 : vector<16x32xf32>
    %cst_56 = arith.constant 0.000000e+00 : f32
    %68 = vector.broadcast %cst_56 : f32 to vector<16x32xf32>
    %69 = arith.maximumf %67, %68 : vector<16x32xf32>
    %70 = vector.broadcast %46 : vector<1x32xf32> to vector<16x32xf32>
    %71 = arith.mulf %69, %70 : vector<16x32xf32>
    %72 = vector.broadcast %47 : vector<1x32xf32> to vector<16x32xf32>
    %73 = arith.addf %71, %72 : vector<16x32xf32>
    %c0_57 = arith.constant 0 : index
    %c0_58 = arith.constant 0 : index
    %74 = vector.load %arg22[%c0_57, %c0_58] : memref<32x64xf32, #tpu.memory_space<vmem>>, vector<32x64xf32>
    %cst_59 = arith.constant dense<0.000000e+00> : vector<16x64xf32>
    %75 = tpu.matmul %38, %74, %cst_59 {dimension_numbers = #tpu.dot_dimension_numbers<[1], [0], [0], [1], [0, 0, 1, 1], [], []>, precision = #tpu.contract_precision<fp32>} : vector<16x32xf32>, vector<32x64xf32>, vector<16x64xf32> -> vector<16x64xf32>
    %c0_60 = arith.constant 0 : index
    %c0_61 = arith.constant 0 : index
    %76 = vector.load %arg23[%c0_60, %c0_61] : memref<32x64xf32, #tpu.memory_space<vmem>>, vector<32x64xf32>
    %cst_62 = arith.constant dense<0.000000e+00> : vector<16x64xf32>
    %77 = tpu.matmul %73, %76, %cst_62 {dimension_numbers = #tpu.dot_dimension_numbers<[1], [0], [0], [1], [0, 0, 1, 1], [], []>, precision = #tpu.contract_precision<fp32>} : vector<16x32xf32>, vector<32x64xf32>, vector<16x64xf32> -> vector<16x64xf32>
    %78 = arith.addf %75, %77 : vector<16x64xf32>
    %c0_63 = arith.constant 0 : index
    %c0_64 = arith.constant 0 : index
    %79 = vector.load %arg5[%c0_63, %c0_64] : memref<2x16xf32, #tpu.memory_space<vmem>>, vector<2x16xf32>
    %cst_65 = arith.constant dense<0.000000e+00> : vector<2x64xf32>
    %80 = tpu.matmul %79, %78, %cst_65 {dimension_numbers = #tpu.dot_dimension_numbers<[1], [0], [0], [1], [0, 0, 1, 1], [], []>, precision = #tpu.contract_precision<fp32>} : vector<2x16xf32>, vector<16x64xf32>, vector<2x64xf32> -> vector<2x64xf32>
    %c0_66 = arith.constant 0 : index
    %c0_67 = arith.constant 0 : index
    %81 = vector.load %arg24[%c0_66, %c0_67] : memref<1x64xf32, #tpu.memory_space<vmem>>, vector<1x64xf32>
    %82 = vector.broadcast %81 : vector<1x64xf32> to vector<2x64xf32>
    %83 = arith.addf %80, %82 : vector<2x64xf32>
    %cst_68 = arith.constant 0.000000e+00 : f32
    %84 = vector.broadcast %cst_68 : f32 to vector<2x64xf32>
    %85 = arith.cmpf ogt, %83, %84 : vector<2x64xf32>
    %cst_69 = arith.constant 0.00999999977 : f32
    %86 = vector.broadcast %cst_69 : f32 to vector<2x64xf32>
    %87 = arith.mulf %86, %83 : vector<2x64xf32>
    %88 = arith.select %85, %83, %87 : vector<2x64xi1>, vector<2x64xf32>
    %c0_70 = arith.constant 0 : index
    %c0_71 = arith.constant 0 : index
    %89 = vector.load %arg25[%c0_70, %c0_71] : memref<1x64xf32, #tpu.memory_space<vmem>>, vector<1x64xf32>
    %90 = vector.broadcast %89 : vector<1x64xf32> to vector<2x64xf32>
    %91 = arith.mulf %88, %90 : vector<2x64xf32>
    %cst_72 = arith.constant dense<0.000000e+00> : vector<2xf32>
    %92 = vector.multi_reduction <add>, %91, %cst_72 [1] : vector<2x64xf32> to vector<2xf32>
    %93 = vector.shape_cast %92 : vector<2xf32> to vector<2x1xf32>
    %c2 = arith.constant 2 : index
    %94 = memref.load %arg0[%c2] : memref<3xf32, #tpu.memory_space<smem>>
    %95 = vector.broadcast %94 : f32 to vector<2x1xf32>
    %96 = arith.addf %93, %95 : vector<2x1xf32>
    %97 = arith.negf %96 : vector<2x1xf32>
    %98 = math.exp %97 : vector<2x1xf32>
    %cst_73 = arith.constant 1.000000e+00 : f32
    %99 = vector.broadcast %cst_73 : f32 to vector<2x1xf32>
    %100 = arith.addf %99, %98 : vector<2x1xf32>
    %101 = arith.divf %99, %100 : vector<2x1xf32>
    %c0_74 = arith.constant 0 : index
    %c0_75 = arith.constant 0 : index
    %102 = vector.load %arg26[%c0_74, %c0_75] : memref<2x1xf32, #tpu.memory_space<vmem>>, vector<2x1xf32>
    tpu.vector_store %arg26[%c0_74, %c0_75], %101 {strides = array<i32>} : memref<2x1xf32, #tpu.memory_space<vmem>>, vector<2x1xf32>,
    return
  }
}

</mosaic_0001>

<bundles_post_ra>
// kernel: gin_molhiv_forward.1
= control target key start
LH: loop header
LB: loop body
LE: loop exit
PB: predicated region body
PF: predicated region fallthrough
CT: control target
= control target key end

     0   :  { %s3812_s0 = inlined_call_operand.vmem [shape: f32[3], index: 0, kind: input, shape index: {}]   ;;  %s3813_s1 = inlined_call_operand.vmem [shape: f32[16,8], index: 1, kind: input, shape index: {}]   ;;  %s3814_s2 = inlined_call_operand.vmem [shape: f32[32,16], index: 2, kind: input, shape index: {}]   ;;  %s3815_s3 = inlined_call_operand.vmem [shape: f32[16,32], index: 3, kind: input, shape index: {}]   ;;  %s3816_s4 = inlined_call_operand.vmem [shape: f32[32,4], index: 4, kind: input, shape index: {}]   ;;  %s3817_s5 = inlined_call_operand.vmem [shape: f32[2,16], index: 5, kind: input, shape index: {}]   ;;  %s3818_s6 = inlined_call_operand.vmem [shape: f32[4,8], index: 6, kind: input, shape index: {}]   ;;  %s3819_s7 = inlined_call_operand.vmem [shape: f32[1,8], index: 7, kind: input, shape index: {}]   ;;  %s3820_s8 = inlined_call_operand.vmem [shape: f32[8,32], index: 8, kind: input, shape index: {}]   ;;  %s3821_s9 = inlined_call_operand.vmem [shape: f32[1,32], index: 9, kind: input, shape index: {}]   ;;  %s3822_s10 = inlined_call_operand.vmem [shape: f32[32,32], index: 10, kind: input, shape index: {}]   ;;  %s3823_s11 = inlined_call_operand.vmem [shape: f32[1,32], index: 11, kind: input, shape index: {}]   ;;  %s3824_s12 = inlined_call_operand.vmem [shape: f32[1,32], index: 12, kind: input, shape index: {}]   ;;  %s3825_s13 = inlined_call_operand.vmem [shape: f32[1,32], index: 13, kind: input, shape index: {}]   ;;  %s3826_s14 = inlined_call_operand.vmem [shape: f32[4,32], index: 14, kind: input, shape index: {}]   ;;  %s3827_s15 = inlined_call_operand.vmem [shape: f32[1,32], index: 15, kind: input, shape index: {}]   ;;  %s3828_s16 = inlined_call_operand.vmem [shape: f32[32,32], index: 16, kind: input, shape index: {}]   ;;  %s3829_s17 = inlined_call_operand.vmem [shape: f32[1,32], index: 17, kind: input, shape index: {}]   ;;  %s3830_s18 = inlined_call_operand.vmem [shape: f32[32,32], index: 18, kind: input, shape index: {}]   ;;  %s3831_s19 = inlined_call_operand.vmem [shape: f32[1,32], index: 19, kind: input, shape index: {}]   ;;  %s3832_s20 = inlined_call_operand.vmem [shape: f32[1,32], index: 20, kind: input, shape index: {}]   ;;  %s3833_s21 = inlined_call_operand.vmem [shape: f32[1,32], index: 21, kind: input, shape index: {}]   ;;  %s3834_s22 = inlined_call_operand.vmem [shape: f32[32,64], index: 22, kind: input, shape index: {}]   ;;  %s3835_s23 = inlined_call_operand.vmem [shape: f32[32,64], index: 23, kind: input, shape index: {}]   ;;  %s3836_s24 = inlined_call_operand.vmem [shape: f32[1,64], index: 24, kind: input, shape index: {}]   ;;  %s3837_s25 = inlined_call_operand.vmem [shape: f32[1,64], index: 25, kind: input, shape index: {}]   ;;  %s3838_s26 = inlined_call_operand.vmem [shape: f32[2,1], index: 26, kind: output, shape index: {}]  }
   0x1   :  { %3867 = sst [smem:[#allocation24_spill]] %s3812_s0 }
   0x2   :  { %3868 = sst [smem:[#allocation25_spill]] %s3813_s1 }
   0x3   :  { %3869 = sst [smem:[#allocation26_spill]] %s3814_s2 }
   0x4   :  { %3870 = sst [smem:[#allocation27_spill]] %s3815_s3 }
   0x5   :  { %3871 = sst [smem:[#allocation28_spill]] %s3816_s4 }
   0x6   :  { %3872 = sst [smem:[#allocation29_spill]] %s3817_s5 }
   0x7   :  { %3873 = sst [smem:[#allocation30_spill]] %s3818_s6 }
   0x8   :  { %3874 = sst [smem:[#allocation31_spill]] %s3819_s7 }
   0x9   :  { %3875 = sst [smem:[#allocation32_spill]] %s3820_s8 }
   0xa   :  { %3876 = sst [smem:[#allocation33_spill]] %s3821_s9 }
   0xb   :  { %3877 = sst [smem:[#allocation34_spill]] %s3822_s10 }
   0xc   :  { %31 = vsyncpa [#allocation3], 0  ;;  %s3878_s7 = sld [smem:[#allocation24_spill]]  ;;  %s3195_s8 = smov [#allocation2]  }
  0x12   :  { %s37_s28 = sshll.u32 %s3878_s7, 4  ;;  %s38_s28 = int_to_ptr.vmem [resolvable:$true] %s37_s28 }
  0x13   :  { %40 = dma.vmem_to_smem %s38_s28, 16, %s3195_s8, [#allocation3]  }
  0x14   :  { %3193 = dma.done.wait [#allocation3], 16  }
  0x15   :  { %3194 = vsyncadd [#allocation3], 4294967280 }
  0x16   :  { %95 = sfence }
  0x17   :  { %s3879_s0 = sld [smem:[#allocation30_spill]]  ;;  %vm136_vm0 = vcmask 1043456   ;;  %vm123_vm1 = vcmask 31744   ;;  %vm379_vm2 = vcmask 130048   ;;  %vm652_vm3 = vcmask 261120  }
  0x18   :  { %s3880_s2 = sld [smem:[#allocation28_spill]]  ;;  %vm878_vm4 = vcmask 64512   ;;  %vm3128_vm6 = vcmask 517120   ;;  %vm3154_vm10 = vcmask 1024  }
  0x19   :  { %s3881_s7 = sld [smem:[#allocation25_spill]] }
  0x1a   :  { %s3883_s30 = sld [smem:[#allocation26_spill]] }
  0x1b   :  { %s3902_s28 = sld [smem:[#allocation31_spill]] }
  0x1c   :  { %s3903_s29 = sld [smem:[#allocation27_spill]] }
  0x1d   :  { %v108_v0 = vld [vmem:[%s3879_s0] sm:$0xf]  ;;  %s3904_s5 = sld [smem:[#allocation32_spill]] }
  0x1e   :  { %v102_v1 = vld [vmem:[%s3880_s2] sm:$0xff]  ;;  %v138_v2 = vsel %vm136_vm0, %v108_v0, 0  ;;  %v103_v3 = vld [vmem:[%s3880_s2 + $0x8] sm:$0xff]  ;;  %v104_v4 = vld [vmem:[%s3880_s2 + $0x10] sm:$0xff]  ;;  %s110_s10 = sld [smem:[#allocation2]] }
  0x1f   :  { %v155_v5 = vand.u32 4294901760, %v138_v2  ;;  %v125_v6 = vsel %vm123_vm1, %v102_v1, 0  ;;  %v128_v7 = vsel %vm123_vm1, %v103_v3, 0  ;;  %v3352_v8 = vld [vmem:[%s3881_s7 + $0x8] sm:$0xff]  ;;  %v3357_v9 = vld [vmem:[%s3881_s7] sm:$0xff]  ;;  %v131_v13 = vsel %vm123_vm1, %v104_v4, 0 }
  0x20   :  { %v3359_v10 = vand.u32 4294901760, %v125_v6  ;;  %v3361_v11 = vand.u32 4294901760, %v128_v7  ;;  %v406_v14 = vand.u32 4294901760, %v3352_v8  ;;  %v408_v15 = vand.u32 4294901760, %v3357_v9  ;;  %v105_v31 = vld [vmem:[%s3880_s2 + $0x18] sm:$0xff]  ;;  %v96_v36 = vld [vmem:[%s3883_s30] sm:$0xff] }
  0x21   :  { %v206_v12 = vsub.f32 %v138_v2, %v155_v5  ;;  %156 = vmatpush.msra.mxu0 %v155_v5  ;;  %283 = vmatpush.msra.mxu3 %v155_v5  ;;  %v3377_v21 = vand.u32 4294901760, %v131_v13  ;;  %v134_v37 = vsel %vm123_vm1, %v105_v31, 0  ;;  %v381_v39 = vsel %vm379_vm2, %v96_v36, 0  ;;  %v97_v46 = vld [vmem:[%s3883_s30 + $0x8] sm:$0xff]  ;;  %v98_v54 = vld [vmem:[%s3883_s30 + $0x10] sm:$0xff]  ;;  %v99_v62 = vld [vmem:[%s3883_s30 + $0x18] sm:$0xff] }
  0x22   :  { %v3367_v16 = vsub.f32 %v125_v6, %v3359_v10  ;;  %v3370_v17 = vsub.f32 %v128_v7, %v3361_v11  ;;  %v458_v19 = vsub.f32 %v3352_v8, %v406_v14  ;;  %v464_v25 = vsub.f32 %v3357_v9, %v408_v15  ;;  %s3905_s3 = sld [smem:[#allocation34_spill]] }
  0x23   :  { %245 = vmatpush.msra.mxu2 %v206_v12  ;;  %v207_v18 = vand.u32 4294901760, %v206_v12  ;;  %v3396_v35 = vsub.f32 %v131_v13, %v3377_v21  ;;  %v3410_v42 = vand.u32 4294901760, %v134_v37  ;;  %v3412_v43 = vand.u32 4294901760, %v381_v39  ;;  %s3906_s2 = sld [smem:[#allocation33_spill]] }
  0x24   :  { %248 = vmatmul.f32.vlgmr.msra.gmra.mxu2 %v3367_v16  ;;  %v3375_v20 = vand.u32 4294901760, %v3367_v16  ;;  %v3380_v23 = vand.u32 4294901760, %v3370_v17  ;;  %v459_v24 = vand.u32 4294901760, %v458_v19  ;;  %v465_v29 = vand.u32 4294901760, %v464_v25  ;;  %s648_s6 = sadd.f32 1.0, %s110_s10 }
  0x25   :  { %v208_v22 = vsub.f32 %v206_v12, %v207_v18  ;;  %407 = vmatpush.msrb.mxu2 %v406_v14  ;;  %327 = vmatpush.msrb.mxu0 %v207_v18  ;;  %3882 = vst [vmem:[#allocation5_spill] sm:$0xff] %v3396_v35  ;;  %v3408_v41 = vand.u32 4294901760, %v3396_v35  ;;  %v3419_v45 = vsub.f32 %v134_v37, %v3410_v42  ;;  %v384_v48 = vsel %vm379_vm2, %v97_v46, 0  ;;  %s3926_s27 = sld [smem:[#allocation29_spill]] }
  0x26   :  { %v160_v26 = vsub.f32 %v3367_v16, %v3375_v20  ;;  %287 = vmatmul.f32.vlgmr.msra.gmra.mxu3 %v3375_v20  ;;  %v460_v28 = vsub.f32 %v458_v19, %v459_v24  ;;  %v466_v33 = vsub.f32 %v464_v25, %v465_v29  ;;  %v168_v34 = vsub.f32 %v3370_v17, %v3380_v23 }
  0x27   :  { %v209_v27 = vand.u32 4294901760, %v208_v22  ;;  %409 = vmatpush.msrb.mxu2 %v408_v15  ;;  %3884 = vst [vmem:[#allocation6_spill] sm:$0xff] %v3412_v43  ;;  %v176_v44 = vsub.f32 %v3396_v35, %v3408_v41  ;;  %v3426_v47 = vsub.f32 %v381_v39, %v3412_v43  ;;  %v3433_v50 = vand.u32 4294901760, %v3419_v45 }
  0x28   :  { %v3386_v30 = vand.u32 4294901760, %v160_v26  ;;  %v461_v32 = vand.u32 4294901760, %v460_v28  ;;  %v467_v38 = vand.u32 4294901760, %v466_v33  ;;  %v3404_v40 = vand.u32 4294901760, %v168_v34  ;;  %3885 = vst [vmem:[#allocation7_spill] sm:$0xff] %v3419_v45 }
  0x29   :  { %587 = vmatpush.msra.mxu2 %v459_v24  ;;  %210 = vmatpush.msra.mxu1 %v209_v27  ;;  %3886 = vst [vmem:[#allocation8_spill] sm:$0xff] %v3426_v47  ;;  %v3429_v49 = vand.u32 4294901760, %v176_v44  ;;  %v3436_v51 = vand.u32 4294901760, %v3426_v47  ;;  %v3438_v52 = vand.u32 4294901760, %v384_v48  ;;  %v184_v53 = vsub.f32 %v3419_v45, %v3433_v50 }
  0x2a   :  { %162 = vmatmul.f32.vlgmr.msra.gmra.mxu0 %v3386_v30  ;;  %212 = vmatmul.f32.vlgmr.msra.gmra.mxu1 %v3359_v10  ;;  %3887 = vst [vmem:[#allocation9_spill] sm:$0xff] %v3433_v50  ;;  %v387_v57 = vsel %vm379_vm2, %v98_v54, 0  ;;  %v390_v1 = vsel %vm379_vm2, %v99_v62, 0 }
  0x2b   :  { %462 = vmatpush.msrb.mxu3 %v461_v32  ;;  %361 = vmatpush.msrb.mxu1 %v155_v5  ;;  %3888 = vst [vmem:[#allocation10_spill] sm:$0xff] %v3436_v51  ;;  %v413_v55 = vsub.f32 %v3426_v47, %v3436_v51  ;;  %v3451_v56 = vsub.f32 %v384_v48, %v3438_v52  ;;  %v3454_v58 = vand.u32 4294901760, %v184_v53  ;;  %v3462_v61 = vand.u32 4294901760, %v387_v57 }
  0x2c   :  { %253 = vmatmul.f32.gmra.mxu2 %v3370_v17  ;;  %502 = vmatpush.msra.mxu0 %v458_v19  ;;  %3889 = vst [vmem:[#allocation11_spill] sm:$0xff] %v3438_v52  ;;  %v3482_v4 = vand.u32 4294901760, %v390_v1 }
  0x2d   :  { %468 = vmatpush.msrb.mxu3 %v467_v38  ;;  %591 = vmatpush.msra.mxu2 %v465_v29  ;;  %3890 = vst [vmem:[#allocation12_spill] sm:$0xff] %v3451_v56  ;;  %v3457_v59 = vand.u32 4294901760, %v413_v55  ;;  %v3460_v60 = vand.u32 4294901760, %v3451_v56  ;;  %v3473_v0 = vsub.f32 %v387_v57, %v3462_v61  ;;  %v3165_v57 = vld [vmem:[%s3902_s28] ss:$0 sm:$0xff] }
  0x2e   :  { %293 = vmatmul.f32.gmra.mxu3 %v3380_v23  ;;  %505 = vmatpush.msra.mxu0 %v464_v25  ;;  %3893 = vst [vmem:[#allocation15_spill] sm:$0xff] %v3462_v61  ;;  %v3490_v6 = vsub.f32 %v390_v1, %v3482_v4 }
  0x2f   :  { %624 = vmatpush.msra.mxu3 %v406_v14  ;;  %542 = vmatpush.msra.mxu1 %v406_v14  ;;  %3891 = vst [vmem:[#allocation13_spill] sm:$0xff] %v3457_v59  ;;  %v421_v63 = vsub.f32 %v3451_v56, %v3460_v60  ;;  %v3480_v3 = vand.u32 4294901760, %v3473_v0 }
  0x30   :  { %3892 = vst [vmem:[#allocation14_spill] sm:$0xff] %v3460_v60  ;;  %v3496_v12 = vand.u32 4294901760, %v3490_v6 }
  0x31   :  { %626 = vmatpush.msra.mxu3 %v408_v15  ;;  %544 = vmatpush.msra.mxu1 %v408_v15  ;;  %3894 = vst [vmem:[#allocation16_spill] sm:$0xff] %v3473_v0  ;;  %v3477_v2 = vand.u32 4294901760, %v421_v63  ;;  %v429_v5 = vsub.f32 %v3473_v0, %v3480_v3 }
  0x32   :  { %170 = vmatmul.f32.gmra.mxu0 %v3404_v40  ;;  %216 = vmatmul.f32.gmra.mxu1 %v3361_v11  ;;  %3896 = vst [vmem:[#allocation18_spill] sm:$0xff] %v3480_v3  ;;  %v437_v13 = vsub.f32 %v3490_v6, %v3496_v12 }
  0x33   :  { %3895 = vst [vmem:[#allocation17_spill] sm:$0xff] %v3477_v2  ;;  %v3493_v7 = vand.u32 4294901760, %v429_v5 }
  0x34   :  { %258 = vmatmul.f32.gmra.mxu2 %v3396_v35  ;;  %3897 = vst [vmem:[#allocation19_spill] sm:$0xff] %v3482_v4  ;;  %v3504_v14 = vand.u32 4294901760, %v437_v13 }
  0x35   :  { %3898 = vst [vmem:[#allocation20_spill] sm:$0xff] %v3490_v6 }
  0x36   :  { %299 = vmatmul.f32.gmra.mxu3 %v3408_v41  ;;  %3899 = vst [vmem:[#allocation21_spill] sm:$0xff] %v3493_v7 }
  0x37   :  { %3900 = vst [vmem:[#allocation22_spill] sm:$0xff] %v3496_v12 }
  0x38   :  { %3901 = vst [vmem:[#allocation23_spill] sm:$0xff] %v3504_v14 }
  0x3a   :  { %178 = vmatmul.f32.gmra.mxu0 %v3429_v49  ;;  %220 = vmatmul.f32.gmra.mxu1 %v3377_v21 }
  0x3c   :  { %263 = vmatmul.f32.gmra.mxu2 %v3419_v45 }
  0x3e   :  { %305 = vmatmul.f32.gmra.mxu3 %v3433_v50 }
  0x42   :  { %186 = vmatmul.f32.gmra.mxu0 %v3454_v58  ;;  %224 = vmatmul.f32.gmra.mxu1 %v3410_v42 }
  0x44   :  { %415 = vmatmul.f32.vlgmr.msrb.gmra.mxu2 %v3457_v59 }
  0x46   :  { %470 = vmatmul.f32.vlgmr.msrb.gmra.mxu3 %v3412_v43 }
  0x4a   :  { %329 = vmatmul.f32.vlgmr.msrb.gmra.mxu0 %v3359_v10  ;;  %363 = vmatmul.f32.vlgmr.msrb.gmra.mxu1 %v3359_v10 }
  0x4c   :  { %423 = vmatmul.f32.gmra.mxu2 %v3477_v2 }
  0x4e   :  { %474 = vmatmul.f32.gmra.mxu3 %v3438_v52 }
  0x52   :  { %333 = vmatmul.f32.gmra.mxu0 %v3361_v11  ;;  %367 = vmatmul.f32.gmra.mxu1 %v3361_v11 }
  0x54   :  { %431 = vmatmul.f32.gmra.mxu2 %v3493_v7 }
  0x56   :  { %478 = vmatmul.f32.gmra.mxu3 %v3462_v61 }
  0x5a   :  { %337 = vmatmul.f32.gmra.mxu0 %v3377_v21  ;;  %371 = vmatmul.f32.gmra.mxu1 %v3377_v21 }
  0x5c   :  { %439 = vmatmul.f32.gmra.mxu2 %v3504_v14 }
  0x5e   :  { %482 = vmatmul.f32.gmra.mxu3 %v3482_v4 }
  0x62   :  { %341 = vmatmul.f32.gmra.mxu0 %v3410_v42  ;;  %375 = vmatmul.f32.gmra.mxu1 %v3410_v42 }
  0x64   :  { %593 = vmatmul.f32.vlgmr.msra.gmra.mxu2 %v3412_v43 }
  0x66   :  { %628 = vmatmul.f32.vlgmr.msra.gmra.mxu3 %v3412_v43 }
  0x6a   :  { %508 = vmatmul.f32.vlgmr.msra.gmra.mxu0 %v3426_v47  ;;  %548 = vmatmul.f32.vlgmr.msra.gmra.mxu1 %v3436_v51 }
  0x6c   :  { %597 = vmatmul.f32.gmra.mxu2 %v3438_v52 }
  0x6e   :  { %632 = vmatmul.f32.gmra.mxu3 %v3438_v52 }
  0x72   :  { %513 = vmatmul.f32.gmra.mxu0 %v3451_v56  ;;  %554 = vmatmul.f32.gmra.mxu1 %v3460_v60 }
  0x74   :  { %601 = vmatmul.f32.gmra.mxu2 %v3462_v61 }
  0x76   :  { %636 = vmatmul.f32.gmra.mxu3 %v3462_v61 }
  0x7a   :  { %518 = vmatmul.f32.gmra.mxu0 %v3473_v0  ;;  %560 = vmatmul.f32.gmra.mxu1 %v3480_v3 }
  0x7c   :  { %605 = vmatmul.f32.gmra.mxu2 %v3482_v4 }
  0x7e   :  { %640 = vmatmul.f32.gmra.mxu3 %v3482_v4 }
  0x82   :  { %523 = vmatmul.f32.gmra.mxu0 %v3490_v6  ;;  %566 = vmatmul.f32.gmra.mxu1 %v3496_v12 }
  0xa7   :  { %v163_v15 = vpop.f32.mrf.mxu0  ;;  %v213_v18 = vpop.f32.mrf.mxu1 }
  0xa8   :  { %v249_v19 = vpop.f32.mrf.mxu2  ;;  %v164_v5 = vadd.f32 %v3165_v57, %v163_v15 }
  0xa9   :  { %v288_v22 = vpop.f32.mrf.mxu3 }
  0xaa   :  { %v214_v6 = vadd.f32 %v213_v18, %v164_v5 }
  0xac   :  { %v250_v52 = vadd.f32 %v249_v19, %v214_v6 }
  0xae   :  { %v289_v2 = vadd.f32 %v288_v22, %v250_v52 }
  0xaf   :  { %v171_v24 = vpop.f32.mrf.mxu0  ;;  %v217_v25 = vpop.f32.mrf.mxu1 }
  0xb0   :  { %v254_v26 = vpop.f32.mrf.mxu2  ;;  %v172_v62 = vadd.f32 %v3165_v57, %v171_v24 }
  0xb1   :  { %v294_v27 = vpop.f32.mrf.mxu3 }
  0xb2   :  { %v218_v12 = vadd.f32 %v217_v25, %v172_v62 }
  0xb4   :  { %v255_v14 = vadd.f32 %v254_v26, %v218_v12 }
  0xb6   :  { %v295_v43 = vadd.f32 %v294_v27, %v255_v14 }
  0xb7   :  { %v179_v28 = vpop.f32.mrf.mxu0  ;;  %v221_v29 = vpop.f32.mrf.mxu1 }
  0xb8   :  { %v259_v31 = vpop.f32.mrf.mxu2  ;;  %v180_v61 = vadd.f32 %v3165_v57, %v179_v28 }
  0xb9   :  { %v300_v32 = vpop.f32.mrf.mxu3 }
  0xba   :  { %v222_v7 = vadd.f32 %v221_v29, %v180_v61 }
  0xbc   :  { %v260_v51 = vadd.f32 %v259_v31, %v222_v7 }
  0xbe   :  { %v301_v50 = vadd.f32 %v300_v32, %v260_v51 }
  0xbf   :  { %v187_v33 = vpop.f32.mrf.mxu0  ;;  %v225_v34 = vpop.f32.mrf.mxu1 }
  0xc0   :  { %v264_v36 = vpop.f32.mrf.mxu2  ;;  %v188_v47 = vadd.f32 %v3165_v57, %v187_v33 }
  0xc1   :  { %v306_v37 = vpop.f32.mrf.mxu3 }
  0xc2   :  { %v226_v35 = vadd.f32 %v225_v34, %v188_v47 }
  0xc4   :  { %v265_v62 = vadd.f32 %v264_v36, %v226_v35 }
  0xc6   :  { %v307_v52 = vadd.f32 %v306_v37, %v265_v62  ;;  %v100_v37 = vld [vmem:[%s3903_s29] sm:$0xff] }
  0xc7   :  { %v330_v38 = vpop.f32.mrf.mxu0  ;;  %v364_v39 = vpop.f32.mrf.mxu1 }
  0xc8   :  { %v416_v44 = vpop.f32.mrf.mxu2  ;;  %v331_v59 = vadd.f32 %v330_v38, %v289_v2 }
  0xc9   :  { %v471_v46 = vpop.f32.mrf.mxu3 }
  0xca   :  { %v365_v12 = vadd.f32 %v364_v39, %v331_v59 }
  0xcc   :  { %v417_v61 = vadd.f32 %v416_v44, %v365_v12 }
  0xce   :  { %v472_v2 = vadd.f32 %v471_v46, %v417_v61 }
  0xcf   :  { %v334_v48 = vpop.f32.mrf.mxu0  ;;  %v368_v53 = vpop.f32.mrf.mxu1 }
  0xd0   :  { %v424_v54 = vpop.f32.mrf.mxu2  ;;  %v335_v24 = vadd.f32 %v334_v48, %v295_v43 }
  0xd1   :  { %v475_v55 = vpop.f32.mrf.mxu3 }
  0xd2   :  { %v369_v25 = vadd.f32 %v368_v53, %v335_v24 }
  0xd4   :  { %v425_v6 = vadd.f32 %v424_v54, %v369_v25 }
  0xd6   :  { %v476_v7 = vadd.f32 %v475_v55, %v425_v6 }
  0xd7   :  { %v338_v63 = vpop.f32.mrf.mxu0  ;;  %v372_v1 = vpop.f32.mrf.mxu1 }
  0xd8   :  { %v432_v13 = vpop.f32.mrf.mxu2  ;;  %v339_v26 = vadd.f32 %v338_v63, %v301_v50 }
  0xd9   :  { %v479_v4 = vpop.f32.mrf.mxu3 }
  0xda   :  { %v373_v19 = vadd.f32 %v372_v1, %v339_v26 }
  0xdc   :  { %v433_v27 = vadd.f32 %v432_v13, %v373_v19 }
  0xde   :  { %v480_v32 = vadd.f32 %v479_v4, %v433_v27 }
  0xdf   :  { %v342_v3 = vpop.f32.mrf.mxu0  ;;  %v376_v0 = vpop.f32.mrf.mxu1 }
  0xe0   :  { %v440_v60 = vpop.f32.mrf.mxu2  ;;  %v343_v31 = vadd.f32 %v342_v3, %v307_v52 }
  0xe1   :  { %v483_v56 = vpop.f32.mrf.mxu3 }
  0xe2   :  { %v377_v33 = vadd.f32 %v376_v0, %v343_v31 }
  0xe4   :  { %v441_v44 = vadd.f32 %v440_v60, %v377_v33  ;;  %v101_v60 = vld [vmem:[%s3903_s29 + $0x8] sm:$0xff] }
  0xe5   :  { %v657_v6 = vsel %vm652_vm3, %v101_v60, 0 }
  0xe6   :  { %v484_v0 = vadd.f32 %v483_v56, %v441_v44 }
  0xe7   :  { %v509_v45 = vpop.f32.mrf.mxu0  ;;  %v549_v15 = vpop.f32.mrf.mxu1 }
  0xe8   :  { %v594_v18 = vpop.f32.mrf.mxu2  ;;  %v510_v47 = vadd.f32 %v509_v45, %v472_v2  ;;  %v654_v45 = vsel %vm652_vm3, %v100_v37, 0 }
  0xe9   :  { %v629_v28 = vpop.f32.mrf.mxu3  ;;  %v3535_v63 = vand.u32 4294901760, %v654_v45 }
  0xea   :  { %v550_v35 = vadd.f32 %v549_v15, %v510_v47 }
  0xeb   :  { %v3541_v12 = vsub.f32 %v654_v45, %v3535_v63  ;;  %v111_v45 = vld [vmem:[%s3904_s5] sm:$0xff] }
  0xec   :  { %v595_v3 = vadd.f32 %v594_v18, %v550_v35 }
  0xed   :  { %v3545_v19 = vand.u32 4294901760, %v3541_v12 }
  0xee   :  { %v630_v1 = vadd.f32 %v629_v28, %v595_v3 }
  0xef   :  { %v514_v29 = vpop.f32.mrf.mxu0  ;;  %v555_v14 = vpop.f32.mrf.mxu1  ;;  %v682_v2 = vsub.f32 %v3541_v12, %v3545_v19 }
  0xf0   :  { %v598_v22 = vpop.f32.mrf.mxu2  ;;  %v515_v51 = vadd.f32 %v514_v29, %v476_v7  ;;  %v644_v56 = vmax.f32 %v630_v1, 0.0  ;;  %v3547_v29 = vand.u32 4294901760, %v657_v6 }
  0xf1   :  { %v633_v43 = vpop.f32.mrf.mxu3 }
  0xf2   :  { %v556_v34 = vadd.f32 %v555_v14, %v515_v51  ;;  %v677_v14 = vand.u32 4294901760, %v644_v56  ;;  %v3552_v27 = vsub.f32 %v657_v6, %v3547_v29 }
  0xf4   :  { %v599_v46 = vadd.f32 %v598_v22, %v556_v34  ;;  %v727_v51 = vsub.f32 %v644_v56, %v677_v14  ;;  %v3554_v34 = vand.u32 4294901760, %v682_v2 }
  0xf6   :  { %v634_v4 = vadd.f32 %v633_v43, %v599_v46 }
  0xf7   :  { %v519_v59 = vpop.f32.mrf.mxu0  ;;  %v561_v50 = vpop.f32.mrf.mxu1 }
  0xf8   :  { %v520_v36 = vadd.f32 %v519_v59, %v480_v32  ;;  %v602_v38 = vpop.f32.mrf.mxu2  ;;  %v645_v15 = vmax.f32 %v634_v4, 0.0  ;;  %v3557_v59 = vand.u32 4294901760, %v3552_v27 }
  0xf9   :  { %v637_v39 = vpop.f32.mrf.mxu3 }
  0xfa   :  { %v562_v48 = vadd.f32 %v561_v50, %v520_v36  ;;  %v675_v61 = vand.u32 4294901760, %v645_v15  ;;  %v728_v36 = vand.u32 4294901760, %v727_v51  ;;  %v690_v37 = vsub.f32 %v3552_v27, %v3557_v59 }
  0xfc   :  { %v603_v53 = vadd.f32 %v602_v38, %v562_v48  ;;  %v721_v43 = vsub.f32 %v645_v15, %v675_v61  ;;  %v729_v46 = vsub.f32 %v727_v51, %v728_v36  ;;  %v3564_v3 = vand.u32 4294901760, %v690_v37 }
  0xfe   :  { %v638_v54 = vadd.f32 %v637_v39, %v603_v53  ;;  %v722_v33 = vand.u32 4294901760, %v721_v43  ;;  %v730_v53 = vand.u32 4294901760, %v729_v46 }
  0xff   :  { %v524_v55 = vpop.f32.mrf.mxu0  ;;  %v567_v57 = vpop.f32.mrf.mxu1 }
 0x100   :  { %v646_v5 = vmax.f32 %v638_v54, 0.0  ;;  %v525_v13 = vadd.f32 %v524_v55, %v484_v0  ;;  %v606_v24 = vpop.f32.mrf.mxu2  ;;  %v723_v39 = vsub.f32 %v721_v43, %v722_v33  ;;  %v900_v0 = vand.u32 4294901760, %v111_v45 }
 0x101   :  { %v641_v18 = vpop.f32.mrf.mxu3 }
 0x102   :  { %v568_v25 = vadd.f32 %v567_v57, %v525_v13  ;;  %v673_v26 = vand.u32 4294901760, %v646_v5  ;;  %v724_v48 = vand.u32 4294901760, %v723_v39  ;;  %v935_v4 = vsub.f32 %v111_v45, %v900_v0 }
 0x104   :  { %v607_v62 = vadd.f32 %v606_v24, %v568_v25  ;;  %v715_v7 = vsub.f32 %v646_v5, %v673_v26  ;;  %v936_v54 = vand.u32 4294901760, %v935_v4  ;;  %v649_v5 = vstv %s648_s6 }
 0x105   :  { %v650_v13 = vmul.f32 %v649_v5, %v3357_v9 }
 0x106   :  { %v642_v28 = vadd.f32 %v641_v18, %v607_v62  ;;  %v716_v47 = vand.u32 4294901760, %v715_v7  ;;  %v937_v55 = vsub.f32 %v935_v4, %v936_v54  ;;  %v651_v18 = vmul.f32 %v649_v5, %v3352_v8  ;;  %v114_v5 = vld [vmem:[%s3905_s3 + $0x8] sm:$0xff] }
 0x108   :  { %v647_v52 = vmax.f32 %v642_v28, 0.0  ;;  %v717_v35 = vsub.f32 %v715_v7, %v716_v47  ;;  %v938_v57 = vand.u32 4294901760, %v937_v55  ;;  %v115_v55 = vld [vmem:[%s3905_s3 + $0x10] sm:$0xff] }
 0x10a   :  { %v671_v22 = vand.u32 4294901760, %v647_v52  ;;  %v718_v44 = vand.u32 4294901760, %v717_v35 }
 0x10c   :  { %v709_v31 = vsub.f32 %v647_v52, %v671_v22  ;;  %672 = vmatpush.msrb.mxu0 %v671_v22  ;;  %789 = vmatpush.msrb.mxu3 %v671_v22 }
 0x10e   :  { %674 = vmatpush.msrb.mxu0 %v673_v26  ;;  %755 = vmatpush.msrb.mxu2 %v709_v31  ;;  %v710_v32 = vand.u32 4294901760, %v709_v31 }
 0x10f   :  { %791 = vmatpush.msrb.mxu3 %v673_v26 }
 0x110   :  { %676 = vmatpush.msrb.mxu0 %v675_v61  ;;  %758 = vmatpush.msrb.mxu2 %v715_v7  ;;  %v711_v50 = vsub.f32 %v709_v31, %v710_v32 }
 0x111   :  { %793 = vmatpush.msrb.mxu3 %v675_v61 }
 0x112   :  { %678 = vmatpush.msrb.mxu0 %v677_v14  ;;  %761 = vmatpush.msrb.mxu2 %v721_v43  ;;  %v712_v38 = vand.u32 4294901760, %v711_v50 }
 0x113   :  { %795 = vmatpush.msrb.mxu3 %v677_v14  ;;  %684 = vmatmul.f32.vlgmr.msrb.gmra.mxu0 %v3554_v34 }
 0x114   :  { %824 = vmatpush.msra.mxu0 %v710_v32  ;;  %713 = vmatpush.msrb.mxu1 %v712_v38 }
 0x115   :  { %764 = vmatpush.msrb.mxu2 %v727_v51  ;;  %799 = vmatmul.f32.vlgmr.msrb.gmra.mxu3 %v3545_v19 }
 0x116   :  { %828 = vmatpush.msra.mxu0 %v716_v47  ;;  %719 = vmatpush.msrb.mxu1 %v718_v44 }
 0x117   :  { %767 = vmatmul.f32.vlgmr.msrb.gmra.mxu2 %v3541_v12  ;;  %939 = vmatpush.msra.mxu3 %v938_v57 }
 0x118   :  { %832 = vmatpush.msra.mxu0 %v722_v33  ;;  %725 = vmatpush.msrb.mxu1 %v724_v48 }
 0x119   :  { %901 = vmatpush.msra.mxu2 %v900_v0  ;;  %1052 = vmatpush.msrb.mxu3 %v900_v0 }
 0x11a   :  { %836 = vmatpush.msra.mxu0 %v728_v36  ;;  %731 = vmatpush.msrb.mxu1 %v730_v53 }
 0x11b   :  { %692 = vmatmul.f32.gmra.mxu0 %v3564_v3  ;;  %733 = vmatmul.f32.vlgmr.msrb.gmra.mxu1 %v3535_v63 }
 0x11c   :  { %859 = vmatpush.msra.mxu1 %v671_v22  ;;  %966 = vmatpush.msrb.mxu0 %v935_v4  ;;  %v116_v4 = vld [vmem:[%s3905_s3 + $0x18] sm:$0xff] }
 0x11d   :  { %805 = vmatmul.f32.gmra.mxu3 %v3557_v59  ;;  %1026 = vmatpush.msrb.mxu2 %v936_v54  ;;  %v1085_v54 = vand.u32 4294901760, %v116_v4 }
 0x11e   :  { %861 = vmatpush.msra.mxu1 %v673_v26 }
 0x11f   :  { %772 = vmatmul.f32.gmra.mxu2 %v3552_v27  ;;  %v1123_v57 = vsub.f32 %v116_v4, %v1085_v54  ;;  %v1301_v4 = vld [vmem:[%s3826_s14] sm:$0xf] }
 0x120   :  { %863 = vmatpush.msra.mxu1 %v675_v61 }
 0x122   :  { %865 = vmatpush.msra.mxu1 %v677_v14 }
 0x123   :  { %737 = vmatmul.f32.gmra.mxu1 %v3547_v29  ;;  %838 = vmatmul.f32.vlgmr.msra.gmra.mxu0 %v3535_v63 }
 0x124   :  { %994 = vmatpush.msrb.mxu1 %v900_v0  ;;  %1086 = vmatpush.msra.mxu0 %v1085_v54 }
 0x12b   :  { %842 = vmatmul.f32.gmra.mxu0 %v3547_v29  ;;  %867 = vmatmul.f32.vlgmr.msra.gmra.mxu1 %v3535_v63 }
 0x133   :  { %871 = vmatmul.f32.gmra.mxu1 %v3547_v29 }
 0x190   :  { %v685_v1 = vpop.f32.mrf.mxu0 }
 0x191   :  { %v686_v15 = vadd.f32 %v685_v1, %v650_v13  ;;  %v1087_v1 = vand.u32 4294901760, %v115_v55  ;;  %v1124_v13 = vand.u32 4294901760, %v1123_v57 }
 0x193   :  { %1088 = vmatpush.msra.mxu0 %v1087_v1 }
 0x198   :  { %v693_v24 = vpop.f32.mrf.mxu0  ;;  %v734_v60 = vpop.f32.mrf.mxu1 }
 0x199   :  { %v735_v56 = vadd.f32 %v734_v60, %v686_v15  ;;  %v800_v26 = vpop.f32.mrf.mxu3  ;;  %v694_v6 = vadd.f32 %v693_v24, %v651_v18  ;;  %v1129_v24 = vsub.f32 %v115_v55, %v1087_v1  ;;  %v1089_v60 = vand.u32 4294901760, %v114_v5  ;;  %v113_v15 = vld [vmem:[%s3905_s3] sm:$0xff] }
 0x19a   :  { %v768_v25 = vpop.f32.mrf.mxu2 }
 0x19b   :  { %v769_v61 = vadd.f32 %v768_v25, %v735_v56  ;;  %v1125_v25 = vsub.f32 %v1123_v57, %v1124_v13  ;;  %v1130_v18 = vand.u32 4294901760, %v1129_v24  ;;  %v1135_v56 = vsub.f32 %v114_v5, %v1089_v60  ;;  %1090 = vmatpush.msra.mxu0 %v1089_v60 }
 0x19d   :  { %v801_v14 = vadd.f32 %v800_v26, %v769_v61  ;;  %v1091_v26 = vand.u32 4294901760, %v113_v15  ;;  %v1136_v61 = vand.u32 4294901760, %v1135_v56 }
 0x19f   :  { %1092 = vmatpush.msra.mxu0 %v1091_v26 }
 0x1a0   :  { %v738_v62 = vpop.f32.mrf.mxu1  ;;  %v839_v28 = vpop.f32.mrf.mxu0 }
 0x1a1   :  { %v739_v52 = vadd.f32 %v738_v62, %v694_v6  ;;  %v840_v22 = vadd.f32 %v839_v28, %v801_v14  ;;  %v806_v31 = vpop.f32.mrf.mxu3  ;;  %v1126_v62 = vand.u32 4294901760, %v1125_v25  ;;  %v1131_v6 = vsub.f32 %v1129_v24, %v1130_v18 }
 0x1a2   :  { %v773_v7 = vpop.f32.mrf.mxu2  ;;  %v1141_v28 = vsub.f32 %v113_v15, %v1091_v26 }
 0x1a3   :  { %v774_v2 = vadd.f32 %v773_v7, %v739_v52  ;;  %1127 = vmatpush.msra.mxu1 %v1126_v62  ;;  %v1132_v14 = vand.u32 4294901760, %v1131_v6  ;;  %v1137_v52 = vsub.f32 %v1135_v56, %v1136_v61 }
 0x1a4   :  { %v1142_v7 = vand.u32 4294901760, %v1141_v28 }
 0x1a5   :  { %v807_v8 = vadd.f32 %v806_v31, %v774_v2  ;;  %1133 = vmatpush.msra.mxu1 %v1132_v14  ;;  %v3166_v31 = vld [vmem:[%s3906_s2] ss:$0 sm:$0xff] }
 0x1a8   :  { %v868_v43 = vpop.f32.mrf.mxu1  ;;  %v843_v47 = vpop.f32.mrf.mxu0 }
 0x1a9   :  { %v869_v9 = vadd.f32 %v868_v43, %v840_v22  ;;  %v844_v50 = vadd.f32 %v843_v47, %v807_v8  ;;  %v1138_v22 = vand.u32 4294901760, %v1137_v52  ;;  %v1143_v43 = vsub.f32 %v1141_v28, %v1142_v7 }
 0x1ab   :  { %v880_v51 = vsel %vm878_vm4, %v869_v9, 0  ;;  %1139 = vmatpush.msra.mxu1 %v1138_v22  ;;  %v1144_v2 = vand.u32 4294901760, %v1143_v43 }
 0x1ac   :  { %v902_v32 = vand.u32 4294901760, %v880_v51 }
 0x1ad   :  { %1145 = vmatpush.msra.mxu1 %v1144_v2 }
 0x1ae   :  { %v903_v33 = vsub.f32 %v880_v51, %v902_v32  ;;  %941 = vmatmul.f32.vlgmr.msra.gmra.mxu3 %v902_v32 }
 0x1af   :  { %1203 = vmatpush.msra.mxu3 %v1085_v54 }
 0x1b0   :  { %v872_v35 = vpop.f32.mrf.mxu1  ;;  %969 = vmatmul.f32.vlgmr.msrb.gmra.mxu0 %v903_v33  ;;  %v904_v36 = vand.u32 4294901760, %v903_v33 }
 0x1b1   :  { %v873_v38 = vadd.f32 %v872_v35, %v844_v50  ;;  %1205 = vmatpush.msra.mxu3 %v1087_v1  ;;  %1238 = vmatpush.msrb.mxu0 %v1124_v13 }
 0x1b2   :  { %998 = vmatmul.f32.vlgmr.msrb.gmra.mxu1 %v904_v36  ;;  %v905_v39 = vsub.f32 %v903_v33, %v904_v36 }
 0x1b3   :  { %v883_v37 = vsel %vm878_vm4, %v873_v38, 0  ;;  %1207 = vmatpush.msra.mxu3 %v1089_v60  ;;  %1242 = vmatpush.msrb.mxu0 %v1130_v18 }
 0x1b4   :  { %v910_v44 = vand.u32 4294901760, %v883_v37  ;;  %v906_v46 = vand.u32 4294901760, %v905_v39  ;;  %1273 = vmatpush.msrb.mxu1 %v1085_v54 }
 0x1b5   :  { %1209 = vmatpush.msra.mxu3 %v1091_v26  ;;  %1246 = vmatpush.msrb.mxu0 %v1136_v61 }
 0x1b6   :  { %907 = vmatmul.f32.vlgmr.msra.gmra.mxu2 %v906_v46  ;;  %945 = vmatmul.f32.gmra.mxu3 %v910_v44  ;;  %v911_v48 = vsub.f32 %v883_v37, %v910_v44 }
 0x1b7   :  { %1169 = vmatpush.msra.mxu2 %v1123_v57  ;;  %1250 = vmatpush.msrb.mxu0 %v1142_v7  ;;  %v1320_v57 = vsel %vm136_vm0, %v1301_v4, 0 }
 0x1b8   :  { %974 = vmatmul.f32.gmra.mxu0 %v911_v48  ;;  %v912_v53 = vand.u32 4294901760, %v911_v48  ;;  %1275 = vmatpush.msrb.mxu1 %v1087_v1  ;;  %v1337_v18 = vand.u32 4294901760, %v1320_v57 }
 0x1b9   :  { %1172 = vmatpush.msra.mxu2 %v1129_v24 }
 0x1ba   :  { %1004 = vmatmul.f32.gmra.mxu1 %v912_v53  ;;  %v913_v45 = vsub.f32 %v911_v48, %v912_v53  ;;  %v1388_v62 = vsub.f32 %v1320_v57, %v1337_v18 }
 0x1bb   :  { %1175 = vmatpush.msra.mxu2 %v1135_v56  ;;  %1277 = vmatpush.msrb.mxu1 %v1089_v60 }
 0x1bc   :  { %v914_v0 = vand.u32 4294901760, %v913_v45 }
 0x1bd   :  { %1178 = vmatpush.msra.mxu2 %v1141_v28  ;;  %1279 = vmatpush.msrb.mxu1 %v1091_v26  ;;  %v1389_v28 = vand.u32 4294901760, %v1388_v62 }
 0x1be   :  { %915 = vmatmul.f32.gmra.mxu2 %v914_v0  ;;  %1054 = vmatmul.f32.vlgmr.msrb.gmra.mxu3 %v902_v32 }
 0x1bf   :  { %v1390_v22 = vsub.f32 %v1388_v62, %v1389_v28 }
 0x1c1   :  { %v1391_v2 = vand.u32 4294901760, %v1390_v22  ;;  %v3914_v22 = vld [vmem:[#allocation6_spill] sm:$0xff] }
 0x1c3   :  { %1392 = vmatpush.msrb.mxu3 %v1391_v2  ;;  %v3916_v2 = vld [vmem:[#allocation14_spill] sm:$0xff] }
 0x1c6   :  { %1028 = vmatmul.f32.vlgmr.msrb.gmra.mxu2 %v902_v32  ;;  %1058 = vmatmul.f32.gmra.mxu3 %v910_v44 }
 0x1c7   :  { %1338 = vmatpush.msrb.mxu2 %v1337_v18 }
 0x1ce   :  { %1032 = vmatmul.f32.gmra.mxu2 %v910_v44 }
 0x22d   :  { %v970_v33 = vpop.f32.mrf.mxu0 }
 0x22f   :  { %v999_v38 = vpop.f32.mrf.mxu1 }
 0x231   :  { %v942_v9 = vpop.f32.mrf.mxu3 }
 0x235   :  { %v975_v53 = vpop.f32.mrf.mxu0 }
 0x237   :  { %v1005_v55 = vpop.f32.mrf.mxu1 }
 0x239   :  { %v908_v51 = vpop.f32.mrf.mxu2  ;;  %v946_v32 = vpop.f32.mrf.mxu3 }
 0x23a   :  { %v909_v47 = vadd.f32 %v3166_v31, %v908_v51 }
 0x23c   :  { %v943_v8 = vadd.f32 %v942_v9, %v909_v47 }
 0x23e   :  { %v971_v36 = vadd.f32 %v970_v33, %v943_v8 }
 0x240   :  { %v1000_v37 = vadd.f32 %v999_v38, %v971_v36 }
 0x241   :  { %v916_v50 = vpop.f32.mrf.mxu2  ;;  %v1055_v44 = vpop.f32.mrf.mxu3 }
 0x242   :  { %v917_v35 = vadd.f32 %v3166_v31, %v916_v50 }
 0x244   :  { %v947_v39 = vadd.f32 %v946_v32, %v917_v35 }
 0x246   :  { %v976_v0 = vadd.f32 %v975_v53, %v947_v39 }
 0x248   :  { %v1006_v5 = vadd.f32 %v1005_v55, %v976_v0 }
 0x249   :  { %v1029_v46 = vpop.f32.mrf.mxu2  ;;  %v1059_v25 = vpop.f32.mrf.mxu3 }
 0x24a   :  { %v1030_v48 = vadd.f32 %v1029_v46, %v1000_v37  ;;  %v3168_v37 = vld [vmem:[%s3824_s12] ss:$0 sm:$0xff] }
 0x24b   :  { %v3169_v46 = vld [vmem:[%s3825_s13] ss:$0 sm:$0xff] }
 0x24c   :  { %v1056_v45 = vadd.f32 %v1055_v44, %v1030_v48 }
 0x24e   :  { %v1062_v54 = vmax.f32 %v1056_v45, 0.0 }
 0x250   :  { %v1068_v1 = vsel %vm652_vm3, %v1062_v54, 0 }
 0x251   :  { %v1093_v13 = vand.u32 4294901760, %v1068_v1  ;;  %v1033_v24 = vpop.f32.mrf.mxu2 }
 0x252   :  { %v1034_v60 = vadd.f32 %v1033_v24, %v1006_v5 }
 0x253   :  { %v1094_v15 = vsub.f32 %v1068_v1, %v1093_v13  ;;  %1147 = vmatmul.f32.vlgmr.msra.gmra.mxu1 %v1093_v13 }
 0x254   :  { %v1060_v56 = vadd.f32 %v1059_v25, %v1034_v60  ;;  %1465 = vmatpush.msra.mxu1 %v1337_v18 }
 0x255   :  { %1181 = vmatmul.f32.vlgmr.msra.gmra.mxu2 %v1094_v15  ;;  %v1095_v26 = vand.u32 4294901760, %v1094_v15 }
 0x256   :  { %v1063_v6 = vmax.f32 %v1060_v56, 0.0  ;;  %1509 = vmatpush.msra.mxu2 %v1389_v28  ;;  %v3912_v28 = vld [vmem:[#allocation10_spill] sm:$0xff] }
 0x257   :  { %1213 = vmatmul.f32.vlgmr.msra.gmra.mxu3 %v1095_v26  ;;  %v1096_v61 = vsub.f32 %v1094_v15, %v1095_v26  ;;  %v3910_v26 = vld [vmem:[#allocation13_spill] sm:$0xff] }
 0x258   :  { %v1071_v14 = vsel %vm652_vm3, %v1063_v6, 0  ;;  %1543 = vmatpush.msra.mxu3 %v1337_v18 }
 0x259   :  { %v1101_v52 = vand.u32 4294901760, %v1071_v14  ;;  %v1097_v7 = vand.u32 4294901760, %v1096_v61  ;;  %v3911_v61 = vld [vmem:[#allocation8_spill] sm:$0xff] }
 0x25b   :  { %1098 = vmatmul.f32.vlgmr.msra.gmra.mxu0 %v1097_v7  ;;  %1151 = vmatmul.f32.gmra.mxu1 %v1101_v52  ;;  %v1102_v43 = vsub.f32 %v1071_v14, %v1101_v52  ;;  %v3913_v7 = vld [vmem:[#allocation17_spill] sm:$0xff] }
 0x25c   :  { %1427 = vmatpush.msra.mxu0 %v1388_v62 }
 0x25d   :  { %1186 = vmatmul.f32.gmra.mxu2 %v1102_v43  ;;  %v1103_v9 = vand.u32 4294901760, %v1102_v43 }
 0x25f   :  { %1219 = vmatmul.f32.gmra.mxu3 %v1103_v9  ;;  %v1104_v31 = vsub.f32 %v1102_v43, %v1103_v9  ;;  %v3915_v43 = vld [vmem:[#allocation12_spill] sm:$0xff]  ;;  %v3917_v9 = vld [vmem:[#allocation21_spill] sm:$0xff] }
 0x261   :  { %v1105_v51 = vand.u32 4294901760, %v1104_v31  ;;  %v3918_v31 = vld [vmem:[#allocation11_spill] sm:$0xff] }
 0x263   :  { %1106 = vmatmul.f32.gmra.mxu0 %v1105_v51  ;;  %1281 = vmatmul.f32.vlgmr.msrb.gmra.mxu1 %v1093_v13  ;;  %v3919_v51 = vld [vmem:[#allocation16_spill] sm:$0xff] }
 0x265   :  { %1344 = vmatmul.f32.vlgmr.msrb.gmra.mxu2 %v3386_v30  ;;  %v3908_v30 = vld [vmem:[#allocation9_spill] sm:$0xff] }
 0x267   :  { %1394 = vmatmul.f32.vlgmr.msrb.gmra.mxu3 %v3359_v10 }
 0x26b   :  { %1252 = vmatmul.f32.vlgmr.msrb.gmra.mxu0 %v1093_v13  ;;  %1285 = vmatmul.f32.gmra.mxu1 %v1101_v52 }
 0x26d   :  { %1352 = vmatmul.f32.gmra.mxu2 %v3404_v40 }
 0x26f   :  { %1398 = vmatmul.f32.gmra.mxu3 %v3361_v11 }
 0x273   :  { %1256 = vmatmul.f32.gmra.mxu0 %v1101_v52  ;;  %1469 = vmatmul.f32.vlgmr.msra.gmra.mxu1 %v3375_v20  ;;  %v3907_v20 = vld [vmem:[#allocation5_spill] sm:$0xff] }
 0x275   :  { %1360 = vmatmul.f32.gmra.mxu2 %v3429_v49 }
 0x277   :  { %1402 = vmatmul.f32.gmra.mxu3 %v3377_v21 }
 0x27b   :  { %1430 = vmatmul.f32.vlgmr.msra.gmra.mxu0 %v3367_v16  ;;  %1475 = vmatmul.f32.gmra.mxu1 %v3380_v23  ;;  %v3909_v16 = vld [vmem:[#allocation7_spill] sm:$0xff] }
 0x27d   :  { %1368 = vmatmul.f32.gmra.mxu2 %v3454_v58 }
 0x27f   :  { %1406 = vmatmul.f32.gmra.mxu3 %v3410_v42 }
 0x283   :  { %1435 = vmatmul.f32.gmra.mxu0 %v3370_v17  ;;  %1481 = vmatmul.f32.gmra.mxu1 %v3408_v41 }
 0x285   :  { %1511 = vmatmul.f32.vlgmr.msra.gmra.mxu2 %v3359_v10 }
 0x287   :  { %1545 = vmatmul.f32.vlgmr.msra.gmra.mxu3 %v3359_v10  ;;  %v3167_v10 = vld [vmem:[%s3823_s11] ss:$0 sm:$0xff] }
 0x28b   :  { %1440 = vmatmul.f32.gmra.mxu0 %v3907_v20  ;;  %1487 = vmatmul.f32.gmra.mxu1 %v3908_v30  ;;  %v3920_v20 = vld [vmem:[#allocation18_spill] sm:$0xff]  ;;  %v3921_v30 = vld [vmem:[#allocation23_spill] sm:$0xff] }
 0x28d   :  { %1515 = vmatmul.f32.gmra.mxu2 %v3361_v11 }
 0x28f   :  { %1549 = vmatmul.f32.gmra.mxu3 %v3361_v11 }
 0x293   :  { %1445 = vmatmul.f32.gmra.mxu0 %v3909_v16  ;;  %v3922_v16 = vld [vmem:[#allocation15_spill] sm:$0xff] }
 0x295   :  { %1519 = vmatmul.f32.gmra.mxu2 %v3377_v21 }
 0x297   :  { %1553 = vmatmul.f32.gmra.mxu3 %v3377_v21 }
 0x29d   :  { %1523 = vmatmul.f32.gmra.mxu2 %v3410_v42 }
 0x29f   :  { %1557 = vmatmul.f32.gmra.mxu3 %v3410_v42 }
 0x2d0   :  { %v1148_v17 = vpop.f32.mrf.mxu1 }
 0x2d8   :  { %v1099_v23 = vpop.f32.mrf.mxu0  ;;  %v1152_v41 = vpop.f32.mrf.mxu1 }
 0x2d9   :  { %v1100_v40 = vadd.f32 %v3167_v10, %v1099_v23  ;;  %v1182_v11 = vpop.f32.mrf.mxu2  ;;  %v3925_v23 = vld [vmem:[#allocation19_spill] sm:$0xff] }
 0x2da   :  { %v1214_v8 = vpop.f32.mrf.mxu3 }
 0x2db   :  { %v1149_v49 = vadd.f32 %v1148_v17, %v1100_v40  ;;  %v3923_v17 = vld [vmem:[#allocation20_spill] sm:$0xff] }
 0x2dd   :  { %v1183_v47 = vadd.f32 %v1182_v11, %v1149_v49 }
 0x2df   :  { %v1215_v33 = vadd.f32 %v1214_v8, %v1183_v47 }
 0x2e0   :  { %v1107_v58 = vpop.f32.mrf.mxu0  ;;  %v1282_v50 = vpop.f32.mrf.mxu1 }
 0x2e1   :  { %v1108_v32 = vadd.f32 %v3167_v10, %v1107_v58  ;;  %v1187_v42 = vpop.f32.mrf.mxu2  ;;  %v3924_v10 = vld [vmem:[#allocation22_spill] sm:$0xff] }
 0x2e2   :  { %v1220_v48 = vpop.f32.mrf.mxu3 }
 0x2e3   :  { %v1153_v21 = vadd.f32 %v1152_v41, %v1108_v32 }
 0x2e5   :  { %v1188_v38 = vadd.f32 %v1187_v42, %v1153_v21 }
 0x2e7   :  { %v1221_v53 = vadd.f32 %v1220_v48, %v1188_v38 }
 0x2e8   :  { %v1253_v35 = vpop.f32.mrf.mxu0  ;;  %v1286_v55 = vpop.f32.mrf.mxu1 }
 0x2e9   :  { %v1254_v36 = vadd.f32 %v1253_v35, %v1215_v33  ;;  %v1345_v40 = vpop.f32.mrf.mxu2 }
 0x2ea   :  { %v1395_v41 = vpop.f32.mrf.mxu3 }
 0x2eb   :  { %v1283_v39 = vadd.f32 %v1282_v50, %v1254_v36 }
 0x2ed   :  { %v1289_v44 = vmax.f32 %v1283_v39, 0.0 }
 0x2ef   :  { %v1294_v45 = vmul.f32 %v3168_v37, %v1289_v44 }
 0x2f0   :  { %v1257_v0 = vpop.f32.mrf.mxu0  ;;  %v1470_v8 = vpop.f32.mrf.mxu1 }
 0x2f1   :  { %v3636_v4 = vadd.f32 %v3169_v46, %v1294_v45  ;;  %v1258_v54 = vadd.f32 %v1257_v0, %v1221_v53  ;;  %v1353_v49 = vpop.f32.mrf.mxu2 }
 0x2f2   :  { %v1399_v11 = vpop.f32.mrf.mxu3 }
 0x2f3   :  { %v1287_v57 = vadd.f32 %v1286_v55, %v1258_v54  ;;  %v1577_v5 = vand.u32 4294901760, %v3636_v4 }
 0x2f5   :  { %v1290_v1 = vmax.f32 %v1287_v57, 0.0  ;;  %v1633_v60 = vsub.f32 %v3636_v4, %v1577_v5 }
 0x2f7   :  { %v1295_v13 = vmul.f32 %v3168_v37, %v1290_v1  ;;  %v1634_v18 = vand.u32 4294901760, %v1633_v60 }
 0x2f8   :  { %v1431_v58 = vpop.f32.mrf.mxu0  ;;  %v1476_v35 = vpop.f32.mrf.mxu1 }
 0x2f9   :  { %v3639_v24 = vadd.f32 %v3169_v46, %v1295_v13  ;;  %v1635_v6 = vsub.f32 %v1633_v60, %v1634_v18  ;;  %v1361_v47 = vpop.f32.mrf.mxu2 }
 0x2fa   :  { %v1403_v32 = vpop.f32.mrf.mxu3 }
 0x2fb   :  { %v1575_v15 = vand.u32 4294901760, %v3639_v24  ;;  %v1636_v52 = vand.u32 4294901760, %v1635_v6 }
 0x2fd   :  { %1576 = vmatpush.msrb.mxu0 %v1575_v15  ;;  %1711 = vmatpush.msrb.mxu3 %v1575_v15  ;;  %v1627_v25 = vsub.f32 %v3639_v24, %v1575_v15 }
 0x2ff   :  { %1578 = vmatpush.msrb.mxu0 %v1577_v5  ;;  %1671 = vmatpush.msrb.mxu2 %v1627_v25  ;;  %v1628_v56 = vand.u32 4294901760, %v1627_v25 }
 0x300   :  { %1713 = vmatpush.msrb.mxu3 %v1577_v5  ;;  %1584 = vmatmul.f32.vlgmr.msrb.gmra.mxu0 %v3910_v26  ;;  %v1436_v33 = vpop.f32.mrf.mxu0  ;;  %v1482_v39 = vpop.f32.mrf.mxu1 }
 0x301   :  { %1674 = vmatpush.msrb.mxu2 %v1633_v60  ;;  %1756 = vmatpush.msra.mxu0 %v1628_v56  ;;  %v1629_v62 = vsub.f32 %v1627_v25, %v1628_v56  ;;  %v1369_v21 = vpop.f32.mrf.mxu2  ;;  %v3170_v60 = vld [vmem:[%s3827_s15] ss:$0 sm:$0xff] }
 0x302   :  { %1677 = vmatmul.f32.vlgmr.msrb.gmra.mxu2 %v3911_v61  ;;  %1717 = vmatmul.f32.vlgmr.msrb.gmra.mxu3 %v3912_v28  ;;  %v1407_v50 = vpop.f32.mrf.mxu3  ;;  %v1362_v25 = vadd.f32 %v3170_v60, %v1361_v47 }
 0x303   :  { %1760 = vmatpush.msra.mxu0 %v1634_v18  ;;  %v1630_v14 = vand.u32 4294901760, %v1629_v62  ;;  %v1346_v18 = vadd.f32 %v3170_v60, %v1345_v40 }
 0x304   :  { %v1404_v61 = vadd.f32 %v1403_v32, %v1362_v25 }
 0x305   :  { %1631 = vmatpush.msrb.mxu1 %v1630_v14  ;;  %v1396_v28 = vadd.f32 %v1395_v41, %v1346_v18 }
 0x307   :  { %1637 = vmatpush.msrb.mxu1 %v1636_v52  ;;  %v1370_v52 = vadd.f32 %v3170_v60, %v1369_v21 }
 0x308   :  { %1592 = vmatmul.f32.gmra.mxu0 %v3913_v7  ;;  %1639 = vmatmul.f32.vlgmr.msrb.gmra.mxu1 %v3914_v22  ;;  %v1441_v36 = vpop.f32.mrf.mxu0  ;;  %v1488_v48 = vpop.f32.mrf.mxu1 }
 0x309   :  { %1793 = vmatpush.msra.mxu1 %v1575_v15  ;;  %v1512_v42 = vpop.f32.mrf.mxu2  ;;  %v1354_v15 = vadd.f32 %v3170_v60, %v1353_v49 }
 0x30a   :  { %1682 = vmatmul.f32.gmra.mxu2 %v3915_v43  ;;  %1723 = vmatmul.f32.gmra.mxu3 %v3916_v2  ;;  %v1546_v38 = vpop.f32.mrf.mxu3  ;;  %v1432_v43 = vadd.f32 %v1431_v58, %v1396_v28 }
 0x30b   :  { %1795 = vmatpush.msra.mxu1 %v1577_v5  ;;  %v1400_v6 = vadd.f32 %v1399_v11, %v1354_v15 }
 0x30d   :  { %v1437_v7 = vadd.f32 %v1436_v33, %v1400_v6 }
 0x310   :  { %1600 = vmatmul.f32.gmra.mxu0 %v3917_v9  ;;  %1643 = vmatmul.f32.gmra.mxu1 %v3918_v31  ;;  %v1446_v37 = vpop.f32.mrf.mxu0 }
 0x311   :  { %v1516_v44 = vpop.f32.mrf.mxu2 }
 0x312   :  { %1687 = vmatmul.f32.gmra.mxu2 %v3919_v51  ;;  %1729 = vmatmul.f32.gmra.mxu3 %v3920_v20  ;;  %v1550_v46 = vpop.f32.mrf.mxu3  ;;  %v1477_v51 = vadd.f32 %v1476_v35, %v1437_v7 }
 0x318   :  { %1608 = vmatmul.f32.gmra.mxu0 %v3921_v30  ;;  %1647 = vmatmul.f32.gmra.mxu1 %v3922_v16 }
 0x319   :  { %v1520_v45 = vpop.f32.mrf.mxu2 }
 0x31a   :  { %1692 = vmatmul.f32.gmra.mxu2 %v3923_v17  ;;  %1735 = vmatmul.f32.gmra.mxu3 %v3924_v10  ;;  %v1554_v0 = vpop.f32.mrf.mxu3  ;;  %v1517_v17 = vadd.f32 %v1516_v44, %v1477_v51 }
 0x31c   :  { %v1551_v41 = vadd.f32 %v1550_v46, %v1517_v17 }
 0x320   :  { %1651 = vmatmul.f32.gmra.mxu1 %v3925_v23  ;;  %1762 = vmatmul.f32.vlgmr.msra.gmra.mxu0 %v3914_v22 }
 0x321   :  { %v1524_v57 = vpop.f32.mrf.mxu2 }
 0x322   :  { %v1558_v13 = vpop.f32.mrf.mxu3 }
 0x328   :  { %1766 = vmatmul.f32.gmra.mxu0 %v3918_v31  ;;  %1797 = vmatmul.f32.vlgmr.msra.gmra.mxu1 %v3914_v22  ;;  %v1442_v22 = vadd.f32 %v1441_v36, %v1404_v61 }
 0x32a   :  { %v1483_v20 = vadd.f32 %v1482_v39, %v1442_v22 }
 0x330   :  { %1770 = vmatmul.f32.gmra.mxu0 %v3922_v16  ;;  %1801 = vmatmul.f32.gmra.mxu1 %v3918_v31  ;;  %v1408_v31 = vadd.f32 %v1407_v50, %v1370_v52 }
 0x332   :  { %v1447_v10 = vadd.f32 %v1446_v37, %v1408_v31 }
 0x334   :  { %v1489_v21 = vadd.f32 %v1488_v48, %v1447_v10 }
 0x336   :  { %v1525_v50 = vadd.f32 %v1524_v57, %v1489_v21 }
 0x338   :  { %1774 = vmatmul.f32.gmra.mxu0 %v3925_v23  ;;  %1805 = vmatmul.f32.gmra.mxu1 %v3922_v16  ;;  %v1471_v16 = vadd.f32 %v1470_v8, %v1432_v43  ;;  %v1559_v37 = vadd.f32 %v1558_v13, %v1525_v50 }
 0x33a   :  { %v1513_v49 = vadd.f32 %v1512_v42, %v1471_v16 }
 0x33c   :  { %v1547_v33 = vadd.f32 %v1546_v38, %v1513_v49 }
 0x340   :  { %1809 = vmatmul.f32.gmra.mxu1 %v3925_v23  ;;  %v1521_v23 = vadd.f32 %v1520_v45, %v1483_v20 }
 0x342   :  { %v1555_v32 = vadd.f32 %v1554_v0, %v1521_v23 }
 0x37d   :  { %v1585_v53 = vpop.f32.mrf.mxu0 }
 0x37e   :  { %v1586_v15 = vadd.f32 %v1585_v53, %v1547_v33 }
 0x385   :  { %v1593_v54 = vpop.f32.mrf.mxu0  ;;  %v1640_v55 = vpop.f32.mrf.mxu1 }
 0x386   :  { %v1678_v56 = vpop.f32.mrf.mxu2  ;;  %v1718_v14 = vpop.f32.mrf.mxu3  ;;  %v1594_v36 = vadd.f32 %v1593_v54, %v1551_v41  ;;  %v1641_v25 = vadd.f32 %v1640_v55, %v1586_v15 }
 0x388   :  { %v1679_v6 = vadd.f32 %v1678_v56, %v1641_v25 }
 0x38a   :  { %v1719_v54 = vadd.f32 %v1718_v14, %v1679_v6 }
 0x38d   :  { %v1601_v1 = vpop.f32.mrf.mxu0  ;;  %v1644_v5 = vpop.f32.mrf.mxu1 }
 0x38e   :  { %v1683_v30 = vpop.f32.mrf.mxu2  ;;  %v1724_v40 = vpop.f32.mrf.mxu3  ;;  %v1602_v58 = vadd.f32 %v1601_v1, %v1555_v32  ;;  %v1645_v35 = vadd.f32 %v1644_v5, %v1594_v36 }
 0x390   :  { %v1684_v45 = vadd.f32 %v1683_v30, %v1645_v35 }
 0x392   :  { %v1725_v46 = vadd.f32 %v1724_v40, %v1684_v45 }
 0x395   :  { %v1609_v26 = vpop.f32.mrf.mxu0  ;;  %v1648_v62 = vpop.f32.mrf.mxu1 }
 0x396   :  { %v1688_v60 = vpop.f32.mrf.mxu2  ;;  %v1649_v39 = vadd.f32 %v1648_v62, %v1602_v58  ;;  %v1730_v8 = vpop.f32.mrf.mxu3  ;;  %v1610_v61 = vadd.f32 %v1609_v26, %v1559_v37 }
 0x398   :  { %v1689_v18 = vadd.f32 %v1688_v60, %v1649_v39  ;;  %v1304_v39 = vld [vmem:[%s3828_s16] sm:$0xff] }
 0x399   :  { %v2064_v37 = vand.u32 4294901760, %v1304_v39 }
 0x39a   :  { %v1731_v0 = vadd.f32 %v1730_v8, %v1689_v18 }
 0x39b   :  { %v2114_v6 = vsub.f32 %v1304_v39, %v2064_v37 }
 0x39d   :  { %v1652_v2 = vpop.f32.mrf.mxu1  ;;  %v1763_v9 = vpop.f32.mrf.mxu0 }
 0x39e   :  { %v1653_v48 = vadd.f32 %v1652_v2, %v1610_v61  ;;  %v1693_v38 = vpop.f32.mrf.mxu2  ;;  %v1764_v57 = vadd.f32 %v1763_v9, %v1719_v54  ;;  %v1736_v52 = vpop.f32.mrf.mxu3 }
 0x3a0   :  { %v1694_v5 = vadd.f32 %v1693_v38, %v1653_v48 }
 0x3a2   :  { %v1737_v43 = vadd.f32 %v1736_v52, %v1694_v5 }
 0x3a5   :  { %v1767_v11 = vpop.f32.mrf.mxu0  ;;  %v1798_v47 = vpop.f32.mrf.mxu1 }
 0x3a6   :  { %v1768_v1 = vadd.f32 %v1767_v11, %v1725_v46  ;;  %v1799_v7 = vadd.f32 %v1798_v47, %v1764_v57 }
 0x3a8   :  { %v1813_v56 = vmax.f32 %v1799_v7, 0.0 }
 0x3aa   :  { %v1839_v14 = vand.u32 4294901760, %v1813_v56 }
 0x3ac   :  { %v1889_v23 = vsub.f32 %v1813_v56, %v1839_v14 }
 0x3ad   :  { %v1802_v44 = vpop.f32.mrf.mxu1  ;;  %v1771_v42 = vpop.f32.mrf.mxu0 }
 0x3ae   :  { %v1772_v28 = vadd.f32 %v1771_v42, %v1731_v0  ;;  %v1803_v62 = vadd.f32 %v1802_v44, %v1768_v1  ;;  %v1890_v21 = vand.u32 4294901760, %v1889_v23  ;;  %v2115_v0 = vand.u32 4294901760, %v2114_v6 }
 0x3b0   :  { %v1814_v31 = vmax.f32 %v1803_v62, 0.0  ;;  %v1891_v60 = vsub.f32 %v1889_v23, %v1890_v21  ;;  %v2116_v38 = vsub.f32 %v2114_v6, %v2115_v0 }
 0x3b2   :  { %v1837_v2 = vand.u32 4294901760, %v1814_v31  ;;  %v1892_v50 = vand.u32 4294901760, %v1891_v60  ;;  %v2117_v54 = vand.u32 4294901760, %v2116_v38 }
 0x3b4   :  { %v1883_v10 = vsub.f32 %v1814_v31, %v1837_v2 }
 0x3b5   :  { %v1806_v53 = vpop.f32.mrf.mxu1  ;;  %v1775_v22 = vpop.f32.mrf.mxu0 }
 0x3b6   :  { %v1807_v55 = vadd.f32 %v1806_v53, %v1772_v28  ;;  %v1776_v26 = vadd.f32 %v1775_v22, %v1737_v43  ;;  %v1884_v47 = vand.u32 4294901760, %v1883_v10 }
 0x3b8   :  { %v1815_v13 = vmax.f32 %v1807_v55, 0.0  ;;  %v1885_v36 = vsub.f32 %v1883_v10, %v1884_v47 }
 0x3ba   :  { %v1835_v51 = vand.u32 4294901760, %v1815_v13  ;;  %v1886_v15 = vand.u32 4294901760, %v1885_v36 }
 0x3bc   :  { %v1877_v16 = vsub.f32 %v1815_v13, %v1835_v51 }
 0x3bd   :  { %v1810_v20 = vpop.f32.mrf.mxu1 }
 0x3be   :  { %v1811_v30 = vadd.f32 %v1810_v20, %v1776_v26  ;;  %v1878_v49 = vand.u32 4294901760, %v1877_v16 }
 0x3c0   :  { %v1816_v17 = vmax.f32 %v1811_v30, 0.0  ;;  %v1879_v32 = vsub.f32 %v1877_v16, %v1878_v49 }
 0x3c2   :  { %v1833_v9 = vand.u32 4294901760, %v1816_v17  ;;  %v1880_v58 = vand.u32 4294901760, %v1879_v32 }
 0x3c4   :  { %v1871_v40 = vsub.f32 %v1816_v17, %v1833_v9  ;;  %1834 = vmatpush.msra.mxu2 %v1833_v9  ;;  %1951 = vmatpush.msrb.mxu1 %v1833_v9 }
 0x3c6   :  { %v1872_v11 = vand.u32 4294901760, %v1871_v40  ;;  %1836 = vmatpush.msra.mxu2 %v1835_v51  ;;  %1917 = vmatpush.msrb.mxu0 %v1871_v40 }
 0x3c7   :  { %1953 = vmatpush.msrb.mxu1 %v1835_v51 }
 0x3c8   :  { %v1873_v41 = vsub.f32 %v1871_v40, %v1872_v11  ;;  %1838 = vmatpush.msra.mxu2 %v1837_v2  ;;  %1920 = vmatpush.msrb.mxu0 %v1877_v16 }
 0x3c9   :  { %1955 = vmatpush.msrb.mxu1 %v1837_v2 }
 0x3ca   :  { %1840 = vmatpush.msra.mxu2 %v1839_v14  ;;  %1923 = vmatpush.msrb.mxu0 %v1883_v10  ;;  %v1874_v33 = vand.u32 4294901760, %v1873_v41 }
 0x3cb   :  { %1957 = vmatpush.msrb.mxu1 %v1839_v14  ;;  %1846 = vmatmul.f32.vlgmr.msra.gmra.mxu2 %v3554_v34 }
 0x3cc   :  { %1986 = vmatpush.msrb.mxu2 %v1872_v11  ;;  %1875 = vmatpush.msra.mxu3 %v1874_v33 }
 0x3cd   :  { %1926 = vmatpush.msrb.mxu0 %v1889_v23  ;;  %1961 = vmatmul.f32.vlgmr.msrb.gmra.mxu1 %v3545_v19 }
 0x3ce   :  { %1990 = vmatpush.msrb.mxu2 %v1878_v49  ;;  %1881 = vmatpush.msra.mxu3 %v1880_v58 }
 0x3cf   :  { %1929 = vmatmul.f32.vlgmr.msrb.gmra.mxu0 %v3541_v12  ;;  %v1307_v12 = vld [vmem:[%s3828_s16 + $0x18] sm:$0xff] }
 0x3d0   :  { %1994 = vmatpush.msrb.mxu2 %v1884_v47  ;;  %1887 = vmatpush.msra.mxu3 %v1886_v15  ;;  %v2058_v19 = vand.u32 4294901760, %v1307_v12 }
 0x3d2   :  { %1998 = vmatpush.msrb.mxu2 %v1890_v21  ;;  %1893 = vmatpush.msra.mxu3 %v1892_v50  ;;  %v2096_v34 = vsub.f32 %v1307_v12, %v2058_v19 }
 0x3d3   :  { %1854 = vmatmul.f32.gmra.mxu2 %v3564_v3  ;;  %1895 = vmatmul.f32.vlgmr.msra.gmra.mxu3 %v3535_v63  ;;  %v1305_v3 = vld [vmem:[%s3828_s16 + $0x8] sm:$0xff] }
 0x3d4   :  { %2021 = vmatpush.msrb.mxu3 %v1833_v9  ;;  %2059 = vmatpush.msra.mxu0 %v2058_v19 }
 0x3d5   :  { %1967 = vmatmul.f32.gmra.mxu1 %v3557_v59  ;;  %2142 = vmatpush.msra.mxu2 %v2096_v34 }
 0x3d6   :  { %2023 = vmatpush.msrb.mxu3 %v1835_v51 }
 0x3d7   :  { %1934 = vmatmul.f32.gmra.mxu0 %v3552_v27  ;;  %v1306_v27 = vld [vmem:[%s3828_s16 + $0x10] sm:$0xff]  ;;  %s3161_s16 = sld [smem:[#allocation2 + $0x1]] }
 0x3d8   :  { %2025 = vmatpush.msrb.mxu3 %v1837_v2  ;;  %v2060_v59 = vand.u32 4294901760, %v1306_v27 }
 0x3da   :  { %2027 = vmatpush.msrb.mxu3 %v1839_v14  ;;  %v2102_v35 = vsub.f32 %v1306_v27, %v2060_v59  ;;  %2061 = vmatpush.msra.mxu0 %v2060_v59 }
 0x3db   :  { %1899 = vmatmul.f32.gmra.mxu3 %v3547_v29  ;;  %2000 = vmatmul.f32.vlgmr.msrb.gmra.mxu2 %v3535_v63 }
 0x3dc   :  { %2176 = vmatpush.msra.mxu3 %v2058_v19  ;;  %v2103_v8 = vand.u32 4294901760, %v2102_v35  ;;  %2145 = vmatpush.msra.mxu2 %v2102_v35 }
 0x3dd   :  { %s1817_s30 = sadd.f32 1.0, %s3161_s16 }
 0x3de   :  { %2178 = vmatpush.msra.mxu3 %v2060_v59  ;;  %v2104_v18 = vsub.f32 %v2102_v35, %v2103_v8 }
 0x3df   :  { %v1818_v28 = vstv %s1817_s30 }
 0x3e0   :  { %v2105_v61 = vand.u32 4294901760, %v2104_v18  ;;  %v1819_v5 = vmul.f32 %v1818_v28, %v3636_v4  ;;  %v1820_v22 = vmul.f32 %v1818_v28, %v3639_v24 }
 0x3e3   :  { %2004 = vmatmul.f32.gmra.mxu2 %v3547_v29  ;;  %2029 = vmatmul.f32.vlgmr.msrb.gmra.mxu3 %v3535_v63  ;;  %v2097_v63 = vand.u32 4294901760, %v2096_v34 }
 0x3e5   :  { %v2098_v25 = vsub.f32 %v2096_v34, %v2097_v63  ;;  %v1311_v34 = vld [vmem:[%s3830_s18 + $0x10] sm:$0xff] }
 0x3e7   :  { %v2099_v45 = vand.u32 4294901760, %v2098_v25  ;;  %v1309_v25 = vld [vmem:[%s3830_s18] sm:$0xff] }
 0x3e9   :  { %2100 = vmatpush.msra.mxu1 %v2099_v45  ;;  %v2291_v45 = vand.u32 4294901760, %v1309_v25 }
 0x3eb   :  { %2033 = vmatmul.f32.gmra.mxu3 %v3547_v29  ;;  %v2062_v29 = vand.u32 4294901760, %v1305_v3  ;;  %2106 = vmatpush.msra.mxu1 %v2105_v61  ;;  %v2341_v61 = vsub.f32 %v1309_v25, %v2291_v45 }
 0x3ed   :  { %v2108_v44 = vsub.f32 %v1305_v3, %v2062_v29  ;;  %2180 = vmatpush.msra.mxu3 %v2062_v29  ;;  %2063 = vmatpush.msra.mxu0 %v2062_v29  ;;  %v2287_v3 = vand.u32 4294901760, %v1311_v34 }
 0x3ef   :  { %v2109_v42 = vand.u32 4294901760, %v2108_v44  ;;  %2148 = vmatpush.msra.mxu2 %v2108_v44  ;;  %2182 = vmatpush.msra.mxu3 %v2064_v37 }
 0x3f0   :  { %2065 = vmatpush.msra.mxu0 %v2064_v37 }
 0x3f1   :  { %v2110_v46 = vsub.f32 %v2108_v44, %v2109_v42  ;;  %2151 = vmatpush.msra.mxu2 %v2114_v6 }
 0x3f2   :  { %2211 = vmatpush.msrb.mxu0 %v2097_v63  ;;  %v1310_v63 = vld [vmem:[%s3830_s18 + $0x8] sm:$0xff] }
 0x3f3   :  { %v2111_v48 = vand.u32 4294901760, %v2110_v46  ;;  %v2289_v39 = vand.u32 4294901760, %v1310_v63 }
 0x3f4   :  { %2215 = vmatpush.msrb.mxu0 %v2103_v8 }
 0x3f5   :  { %2112 = vmatpush.msra.mxu1 %v2111_v48  ;;  %v2342_v48 = vand.u32 4294901760, %v2341_v61 }
 0x3f6   :  { %2219 = vmatpush.msrb.mxu0 %v2109_v42 }
 0x3f7   :  { %2118 = vmatpush.msra.mxu1 %v2117_v54  ;;  %v2343_v54 = vsub.f32 %v2341_v61, %v2342_v48 }
 0x3f8   :  { %2223 = vmatpush.msrb.mxu0 %v2115_v0 }
 0x3f9   :  { %2246 = vmatpush.msrb.mxu1 %v2058_v19  ;;  %v1312_v19 = vld [vmem:[%s3830_s18 + $0x18] sm:$0xff] }
 0x3fa   :  { %v2285_v27 = vand.u32 4294901760, %v1312_v19 }
 0x3fb   :  { %2248 = vmatpush.msrb.mxu1 %v2060_v59 }
 0x3fc   :  { %v2323_v59 = vsub.f32 %v1312_v19, %v2285_v27  ;;  %2286 = vmatpush.msrb.mxu2 %v2285_v27 }
 0x3fd   :  { %2250 = vmatpush.msrb.mxu1 %v2062_v29  ;;  %v2329_v29 = vsub.f32 %v1311_v34, %v2287_v3 }
 0x3fe   :  { %v2324_v35 = vand.u32 4294901760, %v2323_v59  ;;  %2288 = vmatpush.msrb.mxu2 %v2287_v3 }
 0x3ff   :  { %2252 = vmatpush.msrb.mxu1 %v2064_v37  ;;  %v2330_v44 = vand.u32 4294901760, %v2329_v29  ;;  %v2335_v37 = vsub.f32 %v1310_v63, %v2289_v39 }
 0x400   :  { %v2325_v8 = vsub.f32 %v2323_v59, %v2324_v35  ;;  %2290 = vmatpush.msrb.mxu2 %v2289_v39 }
 0x401   :  { %v2331_v42 = vsub.f32 %v2329_v29, %v2330_v44  ;;  %v2336_v6 = vand.u32 4294901760, %v2335_v37 }
 0x402   :  { %v2326_v18 = vand.u32 4294901760, %v2325_v8  ;;  %2292 = vmatpush.msrb.mxu2 %v2291_v45  ;;  %v2505_v8 = vld [vmem:[%s3835_s23] sm:$0xff] }
 0x403   :  { %v2332_v46 = vand.u32 4294901760, %v2331_v42  ;;  %v2337_v0 = vsub.f32 %v2335_v37, %v2336_v6 }
 0x404   :  { %2327 = vmatpush.msrb.mxu3 %v2326_v18  ;;  %v2533_v18 = vand.u32 4294901760, %v2505_v8 }
 0x405   :  { %v2338_v38 = vand.u32 4294901760, %v2337_v0 }
 0x406   :  { %2333 = vmatpush.msrb.mxu3 %v2332_v46  ;;  %v2583_v46 = vsub.f32 %v2505_v8, %v2533_v18 }
 0x408   :  { %2339 = vmatpush.msrb.mxu3 %v2338_v38  ;;  %v2584_v38 = vand.u32 4294901760, %v2583_v46 }
 0x44a   :  { %v1962_v7 = vpop.f32.mrf.mxu1 }
 0x44c   :  { %v1930_v55 = vpop.f32.mrf.mxu0 }
 0x44e   :  { %v1847_v1 = vpop.f32.mrf.mxu2 }
 0x44f   :  { %v1848_v62 = vadd.f32 %v1847_v1, %v1819_v5  ;;  %v2344_v1 = vand.u32 4294901760, %v2343_v54 }
 0x451   :  { %2345 = vmatpush.msrb.mxu3 %v2344_v1  ;;  %v2585_v1 = vsub.f32 %v2583_v46, %v2584_v38 }
 0x452   :  { %v1968_v17 = vpop.f32.mrf.mxu1 }
 0x454   :  { %v1935_v20 = vpop.f32.mrf.mxu0 }
 0x456   :  { %v1855_v53 = vpop.f32.mrf.mxu2  ;;  %v1896_v57 = vpop.f32.mrf.mxu3 }
 0x457   :  { %v1897_v52 = vadd.f32 %v1896_v57, %v1848_v62  ;;  %v1856_v56 = vadd.f32 %v1855_v53, %v1820_v22  ;;  %v3171_v53 = vld [vmem:[%s3829_s17] ss:$0 sm:$0xff] }
 0x459   :  { %v1931_v43 = vadd.f32 %v1930_v55, %v1897_v52 }
 0x45b   :  { %v1963_v26 = vadd.f32 %v1962_v7, %v1931_v43 }
 0x45e   :  { %v1900_v13 = vpop.f32.mrf.mxu3  ;;  %v2001_v31 = vpop.f32.mrf.mxu2 }
 0x45f   :  { %v1901_v51 = vadd.f32 %v1900_v13, %v1856_v56  ;;  %v2002_v2 = vadd.f32 %v2001_v31, %v1963_v26 }
 0x461   :  { %v1936_v14 = vadd.f32 %v1935_v20, %v1901_v51 }
 0x463   :  { %v1969_v40 = vadd.f32 %v1968_v17, %v1936_v14 }
 0x466   :  { %v2030_v30 = vpop.f32.mrf.mxu3  ;;  %v2005_v9 = vpop.f32.mrf.mxu2 }
 0x467   :  { %v2031_v16 = vadd.f32 %v2030_v30, %v2002_v2  ;;  %v2006_v11 = vadd.f32 %v2005_v9, %v1969_v40 }
 0x469   :  { %v2041_v10 = vsel %vm652_vm3, %v2031_v16, 0 }
 0x46a   :  { %v2066_v23 = vand.u32 4294901760, %v2041_v10 }
 0x46c   :  { %v2067_v49 = vsub.f32 %v2041_v10, %v2066_v23  ;;  %2120 = vmatmul.f32.vlgmr.msra.gmra.mxu1 %v2066_v23 }
 0x46d   :  { %2403 = vmatpush.msra.mxu1 %v2285_v27 }
 0x46e   :  { %v2068_v47 = vand.u32 4294901760, %v2067_v49  ;;  %v2034_v41 = vpop.f32.mrf.mxu3  ;;  %2154 = vmatmul.f32.vlgmr.msra.gmra.mxu2 %v2067_v49 }
 0x46f   :  { %v2035_v32 = vadd.f32 %v2034_v41, %v2006_v11  ;;  %2405 = vmatpush.msra.mxu1 %v2287_v3  ;;  %2438 = vmatpush.msra.mxu2 %v2324_v35  ;;  %v2506_v35 = vld [vmem:[%s3835_s23 + $0x8] sm:$0xff] }
 0x470   :  { %v2069_v21 = vsub.f32 %v2067_v49, %v2068_v47  ;;  %2186 = vmatmul.f32.vlgmr.msra.gmra.mxu3 %v2068_v47  ;;  %v2531_v25 = vand.u32 4294901760, %v2506_v35 }
 0x471   :  { %v2044_v33 = vsel %vm652_vm3, %v2035_v32, 0  ;;  %2407 = vmatpush.msra.mxu1 %v2289_v39  ;;  %2442 = vmatpush.msra.mxu2 %v2330_v44 }
 0x472   :  { %v2070_v36 = vand.u32 4294901760, %v2069_v21  ;;  %v2074_v58 = vand.u32 4294901760, %v2044_v33  ;;  %2473 = vmatpush.msra.mxu3 %v2285_v27  ;;  %v2508_v27 = vld [vmem:[%s3835_s23 + $0x18] sm:$0xff] }
 0x473   :  { %2409 = vmatpush.msra.mxu1 %v2291_v45  ;;  %2446 = vmatpush.msra.mxu2 %v2336_v6  ;;  %v2527_v34 = vand.u32 4294901760, %v2508_v27 }
 0x474   :  { %v2075_v60 = vsub.f32 %v2044_v33, %v2074_v58  ;;  %2071 = vmatmul.f32.vlgmr.msra.gmra.mxu0 %v2070_v36  ;;  %2124 = vmatmul.f32.gmra.mxu1 %v2074_v58 }
 0x475   :  { %2369 = vmatpush.msra.mxu0 %v2323_v59  ;;  %2450 = vmatpush.msra.mxu2 %v2342_v48  ;;  %v2507_v59 = vld [vmem:[%s3835_s23 + $0x10] sm:$0xff] }
 0x476   :  { %2159 = vmatmul.f32.gmra.mxu2 %v2075_v60  ;;  %v2076_v15 = vand.u32 4294901760, %v2075_v60  ;;  %2475 = vmatpush.msra.mxu3 %v2287_v3  ;;  %v2565_v3 = vsub.f32 %v2508_v27, %v2527_v34  ;;  %v2529_v63 = vand.u32 4294901760, %v2507_v59 }
 0x477   :  { %2372 = vmatpush.msra.mxu0 %v2329_v29 }
 0x478   :  { %2192 = vmatmul.f32.gmra.mxu3 %v2076_v15  ;;  %v2077_v50 = vsub.f32 %v2075_v60, %v2076_v15  ;;  %v2566_v29 = vand.u32 4294901760, %v2565_v3 }
 0x479   :  { %2375 = vmatpush.msra.mxu0 %v2335_v37  ;;  %2477 = vmatpush.msra.mxu3 %v2289_v39  ;;  %v2571_v39 = vsub.f32 %v2507_v59, %v2529_v63 }
 0x47a   :  { %v2078_v12 = vand.u32 4294901760, %v2077_v50  ;;  %v2567_v44 = vsub.f32 %v2565_v3, %v2566_v29 }
 0x47b   :  { %2378 = vmatpush.msra.mxu0 %v2341_v61  ;;  %2479 = vmatpush.msra.mxu3 %v2291_v45  ;;  %v2572_v37 = vand.u32 4294901760, %v2571_v39  ;;  %v2577_v45 = vsub.f32 %v2506_v35, %v2531_v25 }
 0x47c   :  { %2079 = vmatmul.f32.gmra.mxu0 %v2078_v12  ;;  %2254 = vmatmul.f32.vlgmr.msrb.gmra.mxu1 %v2066_v23  ;;  %v2568_v42 = vand.u32 4294901760, %v2567_v44 }
 0x47d   :  { %v2573_v6 = vsub.f32 %v2571_v39, %v2572_v37  ;;  %v2578_v61 = vand.u32 4294901760, %v2577_v45 }
 0x47e   :  { %2569 = vmatpush.msrb.mxu1 %v2568_v42 }
 0x47f   :  { %v2574_v0 = vand.u32 4294901760, %v2573_v6  ;;  %v2579_v48 = vsub.f32 %v2577_v45, %v2578_v61  ;;  %v2732_v6 = vsel %vm652_vm3, %v3636_v4, 0 }
 0x481   :  { %2575 = vmatpush.msrb.mxu1 %v2574_v0  ;;  %v2580_v54 = vand.u32 4294901760, %v2579_v48 }
 0x483   :  { %2581 = vmatpush.msrb.mxu1 %v2580_v54 }
 0x484   :  { %2225 = vmatmul.f32.vlgmr.msrb.gmra.mxu0 %v2066_v23  ;;  %2258 = vmatmul.f32.gmra.mxu1 %v2074_v58 }
 0x485   :  { %2528 = vmatpush.msrb.mxu0 %v2527_v34 }
 0x487   :  { %2530 = vmatpush.msrb.mxu0 %v2529_v63 }
 0x489   :  { %2532 = vmatpush.msrb.mxu0 %v2531_v25 }
 0x48b   :  { %2534 = vmatpush.msrb.mxu0 %v2533_v18 }
 0x48c   :  { %2229 = vmatmul.f32.gmra.mxu0 %v2074_v58 }
 0x4e9   :  { %v2121_v28 = vpop.f32.mrf.mxu1 }
 0x4f1   :  { %v2072_v57 = vpop.f32.mrf.mxu0  ;;  %v2125_v62 = vpop.f32.mrf.mxu1 }
 0x4f2   :  { %v2073_v5 = vadd.f32 %v3171_v53, %v2072_v57  ;;  %v2155_v52 = vpop.f32.mrf.mxu2  ;;  %v3172_v57 = vld [vmem:[%s3831_s19] ss:$0 sm:$0xff] }
 0x4f3   :  { %v2187_v43 = vpop.f32.mrf.mxu3 }
 0x4f4   :  { %v2122_v55 = vadd.f32 %v2121_v28, %v2073_v5 }
 0x4f6   :  { %v2156_v13 = vadd.f32 %v2155_v52, %v2122_v55 }
 0x4f8   :  { %v2188_v31 = vadd.f32 %v2187_v43, %v2156_v13  ;;  %v2502_v43 = vld [vmem:[%s3834_s22 + $0x8] sm:$0xff] }
 0x4f9   :  { %v2080_v7 = vpop.f32.mrf.mxu0  ;;  %v2255_v26 = vpop.f32.mrf.mxu1 }
 0x4fa   :  { %v2081_v22 = vadd.f32 %v3171_v53, %v2080_v7  ;;  %v2160_v2 = vpop.f32.mrf.mxu2  ;;  %v2586_v53 = vand.u32 4294901760, %v2585_v1  ;;  %v2503_v7 = vld [vmem:[%s3834_s22 + $0x10] sm:$0xff] }
 0x4fb   :  { %v2193_v17 = vpop.f32.mrf.mxu3 }
 0x4fc   :  { %v2126_v56 = vadd.f32 %v2125_v62, %v2081_v22  ;;  %2587 = vmatpush.msrb.mxu1 %v2586_v53  ;;  %v2504_v62 = vld [vmem:[%s3834_s22 + $0x18] sm:$0xff]  ;;  %v3743_v22 = vand.u32 4294901760, %v2503_v7 }
 0x4fd   :  { %v3734_v55 = vand.u32 4294901760, %v2504_v62 }
 0x4fe   :  { %v2161_v30 = vadd.f32 %v2160_v2, %v2126_v56  ;;  %v2501_v2 = vld [vmem:[%s3834_s22] sm:$0xff] }
 0x4ff   :  { %v3741_v13 = vsub.f32 %v2504_v62, %v3734_v55  ;;  %v2735_v62 = vsel %vm652_vm3, %v3639_v24, 0 }
 0x500   :  { %v2194_v10 = vadd.f32 %v2193_v17, %v2161_v30 }
 0x501   :  { %v2226_v51 = vpop.f32.mrf.mxu0  ;;  %v2259_v47 = vpop.f32.mrf.mxu1  ;;  %v2788_v56 = vand.u32 4294901760, %v3741_v13 }
 0x502   :  { %v2227_v20 = vadd.f32 %v2226_v51, %v2188_v31  ;;  %v3753_v51 = vsub.f32 %v2503_v7, %v3743_v22 }
 0x504   :  { %v2256_v14 = vadd.f32 %v2255_v26, %v2227_v20  ;;  %v3750_v26 = vand.u32 4294901760, %v2502_v43  ;;  %v2794_v17 = vand.u32 4294901760, %v3753_v51 }
 0x506   :  { %v2262_v16 = vmax.f32 %v2256_v14, 0.0 }
 0x508   :  { %v2268_v9 = vsel %vm652_vm3, %v2262_v16, 0  ;;  %v2789_v16 = vsub.f32 %v3741_v13, %v2788_v56 }
 0x509   :  { %v2293_v23 = vand.u32 4294901760, %v2268_v9  ;;  %v2230_v40 = vpop.f32.mrf.mxu0 }
 0x50a   :  { %v2231_v49 = vadd.f32 %v2230_v40, %v2194_v10  ;;  %v3761_v10 = vand.u32 4294901760, %v2501_v2  ;;  %v2795_v40 = vsub.f32 %v3753_v51, %v2794_v17 }
 0x50b   :  { %v2294_v11 = vsub.f32 %v2268_v9, %v2293_v23  ;;  %2347 = vmatmul.f32.vlgmr.msrb.gmra.mxu3 %v2293_v23  ;;  %v3764_v9 = vsub.f32 %v2502_v43, %v3750_v26 }
 0x50c   :  { %v2260_v41 = vadd.f32 %v2259_v47, %v2231_v49  ;;  %2645 = vmatpush.msrb.mxu3 %v2527_v34 }
 0x50d   :  { %v2295_v32 = vand.u32 4294901760, %v2294_v11  ;;  %2381 = vmatmul.f32.vlgmr.msra.gmra.mxu0 %v2294_v11  ;;  %v2800_v49 = vand.u32 4294901760, %v3764_v9 }
 0x50e   :  { %v2263_v21 = vmax.f32 %v2260_v41, 0.0  ;;  %2647 = vmatpush.msrb.mxu3 %v2529_v63  ;;  %2680 = vmatpush.msra.mxu0 %v2566_v29 }
 0x50f   :  { %v2296_v33 = vsub.f32 %v2294_v11, %v2295_v32  ;;  %2413 = vmatmul.f32.vlgmr.msra.gmra.mxu1 %v2295_v32  ;;  %v3770_v11 = vsub.f32 %v2501_v2, %v3761_v10 }
 0x510   :  { %v2271_v36 = vsel %vm652_vm3, %v2263_v21, 0  ;;  %2649 = vmatpush.msrb.mxu3 %v2531_v25  ;;  %2684 = vmatpush.msra.mxu0 %v2572_v37  ;;  %v2796_v21 = vand.u32 4294901760, %v2795_v40 }
 0x511   :  { %v2297_v58 = vand.u32 4294901760, %v2296_v33  ;;  %v2301_v60 = vand.u32 4294901760, %v2271_v36  ;;  %2715 = vmatpush.msra.mxu1 %v2527_v34  ;;  %v2801_v33 = vsub.f32 %v3764_v9, %v2800_v49 }
 0x512   :  { %2651 = vmatpush.msrb.mxu3 %v2533_v18  ;;  %2688 = vmatpush.msra.mxu0 %v2578_v61 }
 0x513   :  { %2298 = vmatmul.f32.vlgmr.msrb.gmra.mxu2 %v2297_v58  ;;  %2351 = vmatmul.f32.gmra.mxu3 %v2301_v60  ;;  %v2302_v15 = vsub.f32 %v2271_v36, %v2301_v60  ;;  %v2806_v36 = vand.u32 4294901760, %v3770_v11  ;;  %v2802_v58 = vand.u32 4294901760, %v2801_v33 }
 0x514   :  { %2611 = vmatpush.msrb.mxu2 %v2565_v3  ;;  %2692 = vmatpush.msra.mxu0 %v2584_v38  ;;  %v2757_v38 = vand.u32 4294901760, %v2732_v6 }
 0x515   :  { %2386 = vmatmul.f32.gmra.mxu0 %v2302_v15  ;;  %v2303_v50 = vand.u32 4294901760, %v2302_v15  ;;  %2717 = vmatpush.msra.mxu1 %v2529_v63  ;;  %v3173_v63 = vld [vmem:[%s3832_s20] ss:$0 sm:$0xff] }
 0x516   :  { %2614 = vmatpush.msrb.mxu2 %v2571_v39  ;;  %v3174_v39 = vld [vmem:[%s3833_s21] ss:$0 sm:$0xff]  ;;  %v2758_v4 = vsub.f32 %v2732_v6, %v2757_v38 }
 0x517   :  { %2419 = vmatmul.f32.gmra.mxu1 %v2303_v50  ;;  %v2304_v12 = vsub.f32 %v2302_v15, %v2303_v50 }
 0x518   :  { %2617 = vmatpush.msrb.mxu2 %v2577_v45  ;;  %2719 = vmatpush.msra.mxu1 %v2531_v25 }
 0x519   :  { %v2305_v19 = vand.u32 4294901760, %v2304_v12 }
 0x51a   :  { %2620 = vmatpush.msrb.mxu2 %v2583_v46  ;;  %2721 = vmatpush.msra.mxu1 %v2533_v18 }
 0x51b   :  { %2306 = vmatmul.f32.gmra.mxu2 %v2305_v19  ;;  %2481 = vmatmul.f32.vlgmr.msra.gmra.mxu3 %v2293_v23 }
 0x523   :  { %2452 = vmatmul.f32.vlgmr.msra.gmra.mxu2 %v2293_v23  ;;  %2485 = vmatmul.f32.gmra.mxu3 %v2301_v60  ;;  %v2790_v23 = vand.u32 4294901760, %v2789_v16 }
 0x524   :  { %2750 = vmatpush.msra.mxu2 %v3734_v55 }
 0x525   :  { %2791 = vmatpush.msra.mxu3 %v2790_v23 }
 0x526   :  { %2752 = vmatpush.msra.mxu2 %v3743_v22 }
 0x527   :  { %2797 = vmatpush.msra.mxu3 %v2796_v21 }
 0x528   :  { %2754 = vmatpush.msra.mxu2 %v3750_v26 }
 0x529   :  { %2803 = vmatpush.msra.mxu3 %v2802_v58 }
 0x52a   :  { %2756 = vmatpush.msra.mxu2 %v3761_v10 }
 0x52b   :  { %2456 = vmatmul.f32.gmra.mxu2 %v2301_v60  ;;  %v2807_v60 = vsub.f32 %v3770_v11, %v2806_v36 }
 0x52d   :  { %v2808_v27 = vand.u32 4294901760, %v2807_v60 }
 0x52f   :  { %2809 = vmatpush.msra.mxu3 %v2808_v27 }
 0x58a   :  { %v2382_v30 = vpop.f32.mrf.mxu0 }
 0x58c   :  { %v2414_v32 = vpop.f32.mrf.mxu1 }
 0x58e   :  { %v2348_v28 = vpop.f32.mrf.mxu3 }
 0x592   :  { %v2387_v59 = vpop.f32.mrf.mxu0 }
 0x594   :  { %v2420_v25 = vpop.f32.mrf.mxu1 }
 0x596   :  { %v2299_v5 = vpop.f32.mrf.mxu2  ;;  %v2352_v31 = vpop.f32.mrf.mxu3 }
 0x597   :  { %v2300_v52 = vadd.f32 %v3172_v57, %v2299_v5 }
 0x599   :  { %v2349_v20 = vadd.f32 %v2348_v28, %v2300_v52 }
 0x59b   :  { %v2383_v41 = vadd.f32 %v2382_v30, %v2349_v20 }
 0x59d   :  { %v2415_v50 = vadd.f32 %v2414_v32, %v2383_v41 }
 0x59e   :  { %v2307_v14 = vpop.f32.mrf.mxu2  ;;  %v2482_v12 = vpop.f32.mrf.mxu3 }
 0x59f   :  { %v2308_v47 = vadd.f32 %v3172_v57, %v2307_v14 }
 0x5a1   :  { %v2353_v15 = vadd.f32 %v2352_v31, %v2308_v47  ;;  %v2759_v31 = vand.u32 4294901760, %v2758_v4 }
 0x5a3   :  { %v2388_v35 = vadd.f32 %v2387_v59, %v2353_v15 }
 0x5a5   :  { %v2421_v44 = vadd.f32 %v2420_v25, %v2388_v35  ;;  %v2953_v35 = vld [vmem:[%s3926_s27] sm:$0x3] }
 0x5a6   :  { %v2453_v19 = vpop.f32.mrf.mxu2  ;;  %v2486_v42 = vpop.f32.mrf.mxu3  ;;  %v2959_v25 = vsel %vm379_vm2, %v2953_v35, 0 }
 0x5a7   :  { %v2454_v34 = vadd.f32 %v2453_v19, %v2415_v50 }
 0x5a9   :  { %v2483_v3 = vadd.f32 %v2482_v12, %v2454_v34 }
 0x5ab   :  { %v2489_v29 = vmax.f32 %v2483_v3, 0.0 }
 0x5ad   :  { %v2494_v8 = vmul.f32 %v3173_v63, %v2489_v29 }
 0x5ae   :  { %v2457_v37 = vpop.f32.mrf.mxu2 }
 0x5af   :  { %v2499_v45 = vadd.f32 %v3174_v39, %v2494_v8  ;;  %v2458_v18 = vadd.f32 %v2457_v37, %v2421_v44 }
 0x5b1   :  { %v2510_v61 = vsel %vm652_vm3, %v2499_v45, 0  ;;  %v2487_v46 = vadd.f32 %v2486_v42, %v2458_v18  ;;  %v2979_v18 = vand.u32 4294901760, %v2959_v25 }
 0x5b2   :  { %v2535_v0 = vand.u32 4294901760, %v2510_v61 }
 0x5b3   :  { %v2490_v48 = vmax.f32 %v2487_v46, 0.0 }
 0x5b4   :  { %v2536_v54 = vsub.f32 %v2510_v61, %v2535_v0  ;;  %2589 = vmatmul.f32.vlgmr.msrb.gmra.mxu1 %v2535_v0 }
 0x5b5   :  { %v2495_v1 = vmul.f32 %v3173_v63, %v2490_v48  ;;  %2867 = vmatpush.msrb.mxu1 %v3734_v55 }
 0x5b6   :  { %2623 = vmatmul.f32.vlgmr.msrb.gmra.mxu2 %v2536_v54  ;;  %v2537_v28 = vand.u32 4294901760, %v2536_v54 }
 0x5b7   :  { %v2500_v53 = vadd.f32 %v3174_v39, %v2495_v1  ;;  %2869 = vmatpush.msrb.mxu1 %v3743_v22  ;;  %2902 = vmatpush.msrb.mxu2 %v2788_v56  ;;  %v2765_v56 = vand.u32 4294901760, %v2735_v62 }
 0x5b8   :  { %2655 = vmatmul.f32.vlgmr.msrb.gmra.mxu3 %v2537_v28  ;;  %v2538_v57 = vsub.f32 %v2536_v54, %v2537_v28 }
 0x5b9   :  { %v2513_v5 = vsel %vm652_vm3, %v2500_v53, 0  ;;  %2871 = vmatpush.msrb.mxu1 %v3750_v26  ;;  %2906 = vmatpush.msrb.mxu2 %v2794_v17  ;;  %v2766_v2 = vsub.f32 %v2735_v62, %v2765_v56 }
 0x5ba   :  { %v2539_v52 = vand.u32 4294901760, %v2538_v57  ;;  %v2543_v7 = vand.u32 4294901760, %v2513_v5  ;;  %2937 = vmatpush.msrb.mxu3 %v3734_v55  ;;  %v2760_v55 = vsub.f32 %v2758_v4, %v2759_v31 }
 0x5bb   :  { %2873 = vmatpush.msrb.mxu1 %v3761_v10  ;;  %2910 = vmatpush.msrb.mxu2 %v2800_v49 }
 0x5bc   :  { %2540 = vmatmul.f32.vlgmr.msrb.gmra.mxu0 %v2539_v52  ;;  %2593 = vmatmul.f32.gmra.mxu1 %v2543_v7  ;;  %v2544_v43 = vsub.f32 %v2513_v5, %v2543_v7 }
 0x5bd   :  { %2939 = vmatpush.msrb.mxu3 %v3743_v22  ;;  %2833 = vmatpush.msrb.mxu0 %v3741_v13  ;;  %v2761_v22 = vand.u32 4294901760, %v2760_v55  ;;  %v2767_v13 = vand.u32 4294901760, %v2766_v2 }
 0x5be   :  { %2628 = vmatmul.f32.gmra.mxu2 %v2544_v43  ;;  %v2545_v24 = vand.u32 4294901760, %v2544_v43 }
 0x5bf   :  { %2914 = vmatpush.msrb.mxu2 %v2806_v36  ;;  %2941 = vmatpush.msrb.mxu3 %v3750_v26  ;;  %v2768_v26 = vsub.f32 %v2766_v2, %v2767_v13 }
 0x5c0   :  { %2661 = vmatmul.f32.gmra.mxu3 %v2545_v24  ;;  %v2546_v20 = vsub.f32 %v2544_v43, %v2545_v24  ;;  %2836 = vmatpush.msrb.mxu0 %v3753_v51 }
 0x5c1   :  { %2943 = vmatpush.msrb.mxu3 %v3761_v10  ;;  %v2769_v14 = vand.u32 4294901760, %v2768_v26 }
 0x5c2   :  { %v2547_v30 = vand.u32 4294901760, %v2546_v20  ;;  %2839 = vmatpush.msrb.mxu0 %v3764_v9 }
 0x5c4   :  { %2548 = vmatmul.f32.gmra.mxu0 %v2547_v30  ;;  %2723 = vmatmul.f32.vlgmr.msra.gmra.mxu1 %v2535_v0 }
 0x5c5   :  { %2842 = vmatpush.msrb.mxu0 %v3770_v11 }
 0x5c6   :  { %2762 = vmatmul.f32.vlgmr.msra.gmra.mxu2 %v2761_v22 }
 0x5c8   :  { %2811 = vmatmul.f32.vlgmr.msra.gmra.mxu3 %v2757_v38 }
 0x5cc   :  { %2694 = vmatmul.f32.vlgmr.msra.gmra.mxu0 %v2535_v0  ;;  %2727 = vmatmul.f32.gmra.mxu1 %v2543_v7  ;;  %v2980_v0 = vsub.f32 %v2959_v25, %v2979_v18 }
 0x5ce   :  { %2770 = vmatmul.f32.gmra.mxu2 %v2769_v14  ;;  %v2981_v53 = vand.u32 4294901760, %v2980_v0  ;;  %v3175_v14 = vld [vmem:[%s3836_s24] ss:$0 sm:$0xff]  ;;  %s3162_s24 = sld [smem:[#allocation2 + $0x2]] }
 0x5d0   :  { %2815 = vmatmul.f32.gmra.mxu3 %v2765_v56 }
 0x5d4   :  { %2698 = vmatmul.f32.gmra.mxu0 %v2543_v7  ;;  %2877 = vmatmul.f32.vlgmr.msrb.gmra.mxu1 %v2759_v31  ;;  %v2982_v7 = vsub.f32 %v2980_v0, %v2981_v53 }
 0x5d6   :  { %2916 = vmatmul.f32.vlgmr.msrb.gmra.mxu2 %v2757_v38  ;;  %v2983_v24 = vand.u32 4294901760, %v2982_v7 }
 0x5d8   :  { %2945 = vmatmul.f32.vlgmr.msrb.gmra.mxu3 %v2757_v38 }
 0x5dc   :  { %2845 = vmatmul.f32.vlgmr.msrb.gmra.mxu0 %v2758_v4  ;;  %2883 = vmatmul.f32.gmra.mxu1 %v2767_v13 }
 0x5de   :  { %2920 = vmatmul.f32.gmra.mxu2 %v2765_v56 }
 0x5e0   :  { %2949 = vmatmul.f32.gmra.mxu3 %v2765_v56 }
 0x5e4   :  { %2850 = vmatmul.f32.gmra.mxu0 %v2766_v2 }
 0x631   :  { %v2590_v51 = vpop.f32.mrf.mxu1 }
 0x639   :  { %v2541_v16 = vpop.f32.mrf.mxu0  ;;  %v2624_v17 = vpop.f32.mrf.mxu2 }
 0x63a   :  { %v2594_v10 = vpop.f32.mrf.mxu1  ;;  %v2591_v40 = vadd.f32 %v2590_v51, %v2541_v16 }
 0x63b   :  { %v2656_v9 = vpop.f32.mrf.mxu3 }
 0x63c   :  { %v2625_v41 = vadd.f32 %v2624_v17, %v2591_v40 }
 0x63e   :  { %v2657_v21 = vadd.f32 %v2656_v9, %v2625_v41 }
 0x641   :  { %v2549_v23 = vpop.f32.mrf.mxu0  ;;  %v2629_v49 = vpop.f32.mrf.mxu2 }
 0x642   :  { %v2724_v47 = vpop.f32.mrf.mxu1  ;;  %v2595_v33 = vadd.f32 %v2594_v10, %v2549_v23 }
 0x643   :  { %v2662_v11 = vpop.f32.mrf.mxu3 }
 0x644   :  { %v2630_v15 = vadd.f32 %v2629_v49, %v2595_v33 }
 0x646   :  { %v2663_v27 = vadd.f32 %v2662_v11, %v2630_v15  ;;  %v3133_v15 = vstv %s3162_s24 }
 0x649   :  { %v2695_v32 = vpop.f32.mrf.mxu0  ;;  %v2763_v36 = vpop.f32.mrf.mxu2 }
 0x64a   :  { %v2696_v60 = vadd.f32 %v2695_v32, %v2657_v21  ;;  %v2728_v50 = vpop.f32.mrf.mxu1  ;;  %v3176_v21 = vld [vmem:[%s3837_s25] ss:$0 sm:$0xff] }
 0x64b   :  { %v2812_v58 = vpop.f32.mrf.mxu3 }
 0x64c   :  { %v2725_v12 = vadd.f32 %v2724_v47, %v2696_v60 }
 0x64e   :  { %v2764_v3 = vadd.f32 %v2763_v36, %v2725_v12 }
 0x650   :  { %v2813_v29 = vadd.f32 %v2812_v58, %v2764_v3 }
 0x651   :  { %v2699_v19 = vpop.f32.mrf.mxu0  ;;  %v2771_v34 = vpop.f32.mrf.mxu2 }
 0x652   :  { %v2700_v63 = vadd.f32 %v2699_v19, %v2663_v27  ;;  %v2878_v8 = vpop.f32.mrf.mxu1 }
 0x653   :  { %v2816_v59 = vpop.f32.mrf.mxu3 }
 0x654   :  { %v2729_v39 = vadd.f32 %v2728_v50, %v2700_v63 }
 0x656   :  { %v2772_v42 = vadd.f32 %v2771_v34, %v2729_v39 }
 0x658   :  { %v2817_v48 = vadd.f32 %v2816_v59, %v2772_v42 }
 0x659   :  { %v2846_v44 = vpop.f32.mrf.mxu0  ;;  %v2917_v45 = vpop.f32.mrf.mxu2 }
 0x65a   :  { %v2847_v37 = vadd.f32 %v2846_v44, %v2813_v29  ;;  %v2884_v28 = vpop.f32.mrf.mxu1 }
 0x65b   :  { %v2946_v61 = vpop.f32.mrf.mxu3 }
 0x65c   :  { %v2879_v6 = vadd.f32 %v2878_v8, %v2847_v37 }
 0x65e   :  { %v2918_v46 = vadd.f32 %v2917_v45, %v2879_v6 }
 0x660   :  { %v2947_v38 = vadd.f32 %v2946_v61, %v2918_v46 }
 0x661   :  { %v2851_v54 = vpop.f32.mrf.mxu0  ;;  %v2921_v5 = vpop.f32.mrf.mxu2 }
 0x662   :  { %v2852_v1 = vadd.f32 %v2851_v54, %v2817_v48  ;;  %v2977_v57 = vand.u32 4294901760, %v2947_v38 }
 0x663   :  { %v2950_v52 = vpop.f32.mrf.mxu3 }
 0x664   :  { %v2885_v4 = vadd.f32 %v2884_v28, %v2852_v1  ;;  %v3009_v43 = vsub.f32 %v2947_v38, %v2977_v57 }
 0x666   :  { %v2922_v62 = vadd.f32 %v2921_v5, %v2885_v4  ;;  %v3010_v55 = vand.u32 4294901760, %v3009_v43 }
 0x668   :  { %v2951_v31 = vadd.f32 %v2950_v52, %v2922_v62  ;;  %v3011_v22 = vsub.f32 %v3009_v43, %v3010_v55 }
 0x66a   :  { %v2975_v56 = vand.u32 4294901760, %v2951_v31  ;;  %v3012_v26 = vand.u32 4294901760, %v3011_v22 }
 0x66c   :  { %v3003_v20 = vsub.f32 %v2951_v31, %v2975_v56  ;;  %2976 = vmatpush.msra.mxu0 %v2975_v56  ;;  %3060 = vmatpush.msra.mxu3 %v2975_v56 }
 0x66e   :  { %v3004_v2 = vand.u32 4294901760, %v3003_v20  ;;  %2978 = vmatpush.msra.mxu0 %v2977_v57  ;;  %3035 = vmatpush.msra.mxu2 %v3003_v20 }
 0x66f   :  { %3062 = vmatpush.msra.mxu3 %v2977_v57  ;;  %2984 = vmatmul.f32.vlgmr.msra.gmra.mxu0 %v2983_v24 }
 0x670   :  { %v3005_v30 = vsub.f32 %v3003_v20, %v3004_v2  ;;  %3038 = vmatpush.msra.mxu2 %v3009_v43  ;;  %3087 = vmatpush.msrb.mxu0 %v3004_v2 }
 0x671   :  { %3041 = vmatmul.f32.vlgmr.msra.gmra.mxu2 %v2980_v0  ;;  %3066 = vmatmul.f32.vlgmr.msra.gmra.mxu3 %v2981_v53 }
 0x672   :  { %3091 = vmatpush.msrb.mxu0 %v3010_v55  ;;  %v3006_v13 = vand.u32 4294901760, %v3005_v30 }
 0x674   :  { %3007 = vmatpush.msra.mxu1 %v3006_v13 }
 0x676   :  { %3013 = vmatpush.msra.mxu1 %v3012_v26 }
 0x677   :  { %3093 = vmatmul.f32.vlgmr.msrb.gmra.mxu0 %v2979_v18  ;;  %3015 = vmatmul.f32.vlgmr.msra.gmra.mxu1 %v2979_v18 }
 0x678   :  { %3112 = vmatpush.msrb.mxu1 %v2975_v56 }
 0x67a   :  { %3114 = vmatpush.msrb.mxu1 %v2977_v57 }
 0x67f   :  { %3116 = vmatmul.f32.vlgmr.msrb.gmra.mxu1 %v2979_v18 }
 0x6ec   :  { %v2985_v51 = vpop.f32.mrf.mxu0 }
 0x6ed   :  { %v2986_v16 = vadd.f32 %v3175_v14, %v2985_v51 }
 0x6f4   :  { %v3016_v17 = vpop.f32.mrf.mxu1  ;;  %v3042_v10 = vpop.f32.mrf.mxu2 }
 0x6f5   :  { %v3017_v9 = vadd.f32 %v3016_v17, %v2986_v16  ;;  %v3067_v23 = vpop.f32.mrf.mxu3  ;;  %v3094_v49 = vpop.f32.mrf.mxu0 }
 0x6f7   :  { %v3043_v40 = vadd.f32 %v3042_v10, %v3017_v9 }
 0x6f9   :  { %v3068_v11 = vadd.f32 %v3067_v23, %v3043_v40 }
 0x6fb   :  { %v3095_v47 = vadd.f32 %v3094_v49, %v3068_v11 }
 0x6fc   :  { %v3117_v41 = vpop.f32.mrf.mxu1 }
 0x6fd   :  { %v3118_v32 = vadd.f32 %v3117_v41, %v3095_v47 }
 0x6ff   :  { %v3121_v33 = vmul.f32 0.01, %v3118_v32  ;;  %vm3120_vm5 = vcmp.gt.f32.partialorder %v3118_v32, 0.0 }
 0x701   :  { %v3122_v36 = vsel %vm3120_vm5, %v3118_v32, %v3121_v33 }
 0x702   :  { %v3127_v58 = vmul.f32 %v3176_v21, %v3122_v36 }
 0x704   :  { %v3129_v60 = vsel %vm3128_vm6, %v3127_v58, 0.0 }
 0x705   :  { %3130 = vadd.xlane.f32.xlu0 %v3129_v60 }
 0x778   :  { %v3131_v50 = vpop.xlane.xlu0 %3130 }
 0x779   :  { %v3134_v12 = vadd.f32 %v3133_v15, %v3131_v50 }
 0x77b   :  { %v3163_v19 = vmul.f32 -1.442695, %v3134_v12 }
 0x77d   :  { %3177 = vpow2.f32 %v3163_v19 }
 0x783   :  { %v3178_v27 = vpop.eup %3177 }
 0x784   :  { %v3138_v34 = vadd.f32 1.0, %v3178_v27 }
 0x786   :  { %3179 = vrcp.f32 %v3138_v34  ;;  %v3150_v35 = vand.u32 2147483648, %v3138_v34  ;;  %v3148_v39 = vand.u32 2147483647, %v3138_v34  ;;  %vm3144_vm8 = vweird.f32 %v3138_v34 }
 0x788   :  { %v3151_v8 = vor.u32 1.1754944e-38, %v3150_v35  ;;  %vm3149_vm11 = vcmp.eq.f32.partialorder %v3148_v39, 8.507059e+37 }
 0x78c   :  { %v3180_v59 = vpop.eup %3179 }
 0x78d   :  { %v3140_v3 = vmul.f32 %v3180_v59, %v3138_v34  ;;  %vm3145_vm7 = vweird.f32 %v3180_v59 }
 0x78e   :  { %vm3146_vm9 = vmor %vm3144_vm8, %vm3145_vm7 }
 0x78f   :  { %v3141_v63 = vsub.f32 1.0, %v3140_v3 }
 0x791   :  { %v3142_v29 = vmul.f32 %v3180_v59, %v3141_v63 }
 0x793   :  { %v3143_v25 = vadd.f32 %v3180_v59, %v3142_v29 }
 0x795   :  { %v3147_v44 = vsel %vm3146_vm9, %v3180_v59, %v3143_v25 }
 0x796   :  { %v3152_v37 = vsel %vm3149_vm11, %v3151_v8, %v3147_v44 }
 0x797   :  { %3155 = vst.msk [vmem:[%s3838_s26] sm:$0x3] %vm3154_vm10, %v3152_v37 }
 0x798   :  { %3160 = vsyncpa [#allocation3], 1 }

</bundles_post_ra>
